<compile_context>
chip_gen: v6e
topology: v6e:2x2x1
jax: 0.10.0
libtpu: 0.0.40
codegen_flags: <defaults>
</compile_context>

<pallas_src>
import functools

import jax
import jax.numpy as jnp
import numpy as np
from jax.experimental import pallas as pl
from jax.experimental.pallas import tpu as pltpu


# ----------------------------------------------------------------------------
# Kernel: one grid step == `batch_block` batch items, (C, HW) tiles in VMEM.
# ----------------------------------------------------------------------------
def _make_kernel(H, W, C):
    HW = H * W

    def kernel(x_ref, w_big_ref, w_lr_ref, b_cls_ref, ctx_bias_ref,
               x2_shift_ref, w_sse_ref, b_sse_ref, out_ref, mask_ref):
        f32 = jnp.float32

        # ---- per-step constants, hoisted out of the batch-item loop --------
        m_iota = jax.lax.broadcasted_iota(jnp.int32, (1, HW), 1)
        col = m_iota % W
        not_left = jnp.broadcast_to(col != 0, (C, HW))          # j-1 exists
        not_right = jnp.broadcast_to(col != (W - 1), (C, HW))   # j+1 exists
        has_up = jnp.broadcast_to(m_iota >= W, (C, HW))         # i-1 exists
        has_down = jnp.broadcast_to(m_iota < (HW - W), (C, HW)) # i+1 exists

        w_big = w_big_ref[...]       # (M_pad, 3C): [conv-center | ctx | cls | 0]
        w_l = w_lr_ref[0]            # (C, 3C)  kx=0 taps (dx = -1)
        w_r = w_lr_ref[1]            # (C, 3C)  kx=2 taps (dx = +1)
        b_cls = b_cls_ref[0]         # scalar, from SMEM
        ctx_bias_b = jnp.broadcast_to(ctx_bias_ref[...], (C, HW))
        x2_shift_b = jnp.broadcast_to(x2_shift_ref[...], (C, HW))
        w_sse = w_sse_ref[...]       # (C, C), f32
        b_sse = b_sse_ref[...]       # (C, 1)

        cdt = w_big.dtype            # matmul operand dtype (f32 or bf16)

        def mm(w, a):                # MXU matmul, always f32 accumulation
            return jnp.dot(w, a.astype(cdt), preferred_element_type=f32)

        # TODO(synk): for batch_block > ~2 switch this static unroll to
        # lax.fori_loop(..., unroll=True) to bound vreg live ranges.
        for bb in range(x_ref.shape[0]):
            x = x_ref[bb].astype(f32)                      # (C, HW)

            # ---- sse: lane-reduce pool -> 1x1 conv -> sigmoid gate ---------
            pooled = jnp.mean(x, axis=1, keepdims=True)    # (C, 1)
            gate = jax.nn.sigmoid(
                jnp.dot(w_sse, pooled, preferred_element_type=f32) + b_sse)
            x3 = x * gate                                  # (C, HW)

            # ---- 3x3 conv operand: dy shifts are W-lane rolls; top/bottom
            #      image rows zeroed on the operand; 32-row-aligned sublane
            #      concat builds the (3C, HW) operand once. -------------------
            x_up = jnp.where(has_up, pltpu.roll(x, W, axis=1), 0.0)        # x[m-W]
            x_down = jnp.where(has_down, pltpu.roll(x, HW - W, axis=1), 0.0)  # x[m+W]
            y = jnp.concatenate([x_up, x, x_down], axis=0)                 # (3C, HW)

            # ---- widened center matmul: conv center taps + fused cls->ctx
            #      rows + cls-mask row in one (M_pad,3C)@(3C,HW) MXU issue. ---
            big = mm(w_big, y)                             # (M_pad, HW)
            conv = big[:C]
            ctx = jnp.maximum(big[C:2 * C] + ctx_bias_b, 0.0)
            mask_ref[bb] = big[2 * C:2 * C + 1] + b_cls    # lane-dense (1, HW)

            # ---- dx = -1 / +1 taps: 1-lane rolls; wrap lanes are exactly the
            #      column-edge lanes zeroed on the output. ---------------------
            y_l = pltpu.roll(y, 1, axis=1)                 # y[m-1]
            conv = conv + jnp.where(not_left, mm(w_l, y_l), 0.0)
            y_r = pltpu.roll(y, HW - 1, axis=1)            # y[m+1]
            conv = conv + jnp.where(not_right, mm(w_r, y_r), 0.0)

            # ---- x_out = conv3x3(x) + sse(x)*x + context ---------------------
            out_ref[bb] = conv + x2_shift_b + x3 + ctx

    return kernel


# ----------------------------------------------------------------------------
# batch_block selection: one grid step on single-TC v5e/v6e, >=2 parallel
# steps on dual-TC v7x so the ("parallel",) batch axis spans both cores.
# ----------------------------------------------------------------------------
def _auto_batch_block(batch):
    try:
        kind = jax.devices()[0].device_kind.lower()
    except Exception:
        return 1
    if "v7" in kind or "7x" in kind:
        bb = max(batch // 2, 1)
        while batch % bb:
            bb -= 1
        return bb
    return batch


# ----------------------------------------------------------------------------
# Wrapper: grid over batch, channels-first flat layout, lane-dense outputs.
# ----------------------------------------------------------------------------
@functools.partial(jax.jit, static_argnames=("batch_block", "use_bf16"))
def supervised_attention_forward(x_nchw, kp, *, batch_block=None, use_bf16=False):
    B, C, H, W = x_nchw.shape
    HW = H * W
    if batch_block is None:
        batch_block = _auto_batch_block(B)
    assert B % batch_block == 0
    nsteps = B // batch_block
    M_pad = kp["w_big"].shape[0]

    x_flat = x_nchw.reshape(B, C, HW)            # free reshape on HBM
    cdt = jnp.bfloat16 if use_bf16 else jnp.float32
    x_in = x_flat.astype(cdt)
    w_big = kp["w_big"].astype(cdt)
    w_lr = kp["w_lr"].astype(cdt)

    def full(shape):
        nd = len(shape)
        return pl.BlockSpec(shape, lambda b, _nd=nd: (0,) * _nd)

    grid_spec = pltpu.PrefetchScalarGridSpec(
        num_scalar_prefetch=0,
        grid=(nsteps,),
        in_specs=[
            pl.BlockSpec((batch_block, C, HW), lambda b: (b, 0, 0)),   # x
            full((M_pad, 3 * C)),                                      # w_big
            full((2, C, 3 * C)),                                       # w_lr
            pl.BlockSpec(memory_space=pltpu.MemorySpace.SMEM),         # b_cls
            full((C, 1)),                                              # ctx_bias
            full((C, 1)),                                              # x2_shift
            full((C, C)),                                              # w_sse
            full((C, 1)),                                              # b_sse
        ],
        out_specs=[
            pl.BlockSpec((batch_block, C, HW), lambda b: (b, 0, 0)),   # x_out
            pl.BlockSpec((batch_block, 1, HW), lambda b: (b, 0, 0)),   # mask
        ],
    )
    out_shape = (jax.ShapeDtypeStruct((B, C, HW), jnp.float32),
                 jax.ShapeDtypeStruct((B, 1, HW), jnp.float32))

    itemsize = 2 if use_bf16 else 4
    weight_bytes = (w_big.size + w_lr.size) * itemsize + (C * C + 4 * C + 1) * 4
    cost = pl.CostEstimate(
        flops=2 * B * HW * 3 * C * (M_pad + 2 * C) + 2 * B * C * C,
        transcendentals=B * C,
        bytes_accessed=x_in.size * itemsize + (B * C * HW + B * HW) * 4 + weight_bytes,
    )

    x_out_flat, mask_flat = pl.pallas_call(
        _make_kernel(H, W, C),
        grid_spec=grid_spec,
        out_shape=out_shape,
        compiler_params=pltpu.CompilerParams(
            dimension_semantics=("parallel",)),
        cost_estimate=cost,
    )(x_in, w_big, w_lr, kp["b_cls"], kp["ctx_bias"],
      kp["x2_shift"], kp["w_sse"], kp["b_sse"])

    return x_out_flat.reshape(B, C, H, W), mask_flat.reshape(B, 1, H, W)


# ----------------------------------------------------------------------------
# Deterministic parameter construction (PyTorch-shaped) and folding.
# ----------------------------------------------------------------------------
def make_params(key, C):
    ks = jax.random.split(key, 16)
    init = lambda k, shape, s: s * jax.random.normal(k, shape, jnp.float32)
    p = {}
    # cls: Conv2d(C, 1, k=1)           weight (1, C, 1, 1), bias (1,)
    p["cls_w"] = init(ks[0], (1, C, 1, 1), 0.2)
    p["cls_b"] = init(ks[1], (1,), 0.1)
    # conv_context: Conv2d(1, C, k=1) + BatchNorm2d(C)   (eval-mode BN)
    p["ctx_w"] = init(ks[2], (C, 1, 1, 1), 0.2)
    p["ctx_b"] = init(ks[3], (C,), 0.1)
    p["bn1_g"] = 1.0 + 0.1 * jax.random.normal(ks[4], (C,), jnp.float32)
    p["bn1_b"] = init(ks[5], (C,), 0.1)
    p["bn1_m"] = init(ks[6], (C,), 0.1)
    p["bn1_v"] = 0.5 + jax.nn.sigmoid(jax.random.normal(ks[7], (C,), jnp.float32))
    # sse: Conv2d(C, C, k=1)
    p["sse_w"] = init(ks[8], (C, C, 1, 1), 0.2)
    p["sse_b"] = init(ks[9], (C,), 0.1)
    # conv3x3: Conv2d(C, C, k=3, pad=1) + BatchNorm2d(C)
    p["w3"] = init(ks[10], (C, C, 3, 3), 0.1)
    p["b3"] = init(ks[11], (C,), 0.1)
    p["bn2_g"] = 1.0 + 0.1 * jax.random.normal(ks[12], (C,), jnp.float32)
    p["bn2_b"] = init(ks[13], (C,), 0.1)
    p["bn2_m"] = init(ks[14], (C,), 0.1)
    p["bn2_v"] = 0.5 + jax.nn.sigmoid(jax.random.normal(ks[15], (C,), jnp.float32))
    return p


def fold_params(p):
    # TODO(synk): BatchNorm is folded in inference (running-stats) mode; the
    # training-mode batch-statistics path is not reproduced.
    eps = 1e-5
    C = p["bn1_g"].shape[0]
    s1 = p["bn1_g"] / jnp.sqrt(p["bn1_v"] + eps)
    t1 = p["bn1_b"] - p["bn1_m"] * s1
    s2 = p["bn2_g"] / jnp.sqrt(p["bn2_v"] + eps)
    t2 = p["bn2_b"] - p["bn2_m"] * s2

    w_cls = p["cls_w"][0, :, 0, 0]                   # (C,)  cls input weights
    ctx_w_f = p["ctx_w"][:, 0, 0, 0] * s1            # (C,)  ctx conv * BN scale
    ctx_b_f = p["ctx_b"] * s1 + t1                   # (C,)

    # Widened center weight: rows [0:C] = 3x3 conv center-column taps (kx=1,
    # BN2 scale folded, ky blocks along K in y order), rows [C:2C] = rank-1
    # fused cls->ctx chain (center block only), row [2C] = cls-mask row.
    M_pad = ((2 * C + 1 + 15) // 16) * 16            # bf16/f32 sublane friendly
    w_c = jnp.concatenate(
        [p["w3"][:, :, ky, 1] * s2[:, None] for ky in range(3)], axis=1)
    w_big = jnp.zeros((M_pad, 3 * C), jnp.float32)
    w_big = w_big.at[:C].set(w_c)
    w_big = w_big.at[C:2 * C, C:2 * C].set(jnp.outer(ctx_w_f, w_cls))
    w_big = w_big.at[2 * C, C:2 * C].set(w_cls)

    w_l = jnp.concatenate(
        [p["w3"][:, :, ky, 0] * s2[:, None] for ky in range(3)], axis=1)
    w_r = jnp.concatenate(
        [p["w3"][:, :, ky, 2] * s2[:, None] for ky in range(3)], axis=1)

    return {
        "w_big": w_big,                                   # (M_pad, 3C)
        "w_lr": jnp.stack([w_l, w_r], axis=0),            # (2, C, 3C)
        "b_cls": p["cls_b"],                              # (1,)  -> SMEM
        "ctx_bias": (p["cls_b"][0] * ctx_w_f + ctx_b_f).reshape(C, 1),
        "x2_shift": (p["b3"] * s2 + t2).reshape(C, 1),
        "w_sse": p["sse_w"][:, :, 0, 0],                  # (C_out, C_in), f32
        "b_sse": p["sse_b"].reshape(C, 1),
    }


# ----------------------------------------------------------------------------
# Pure-JAX reference (eval-mode BN), NCHW, for a numerical sanity check.
# ----------------------------------------------------------------------------
def reference(x, p):
    eps = 1e-5
    hi = jax.lax.Precision.HIGHEST
    cls_w = p["cls_w"][:, :, 0, 0]                                   # (1, C)
    mask = (jnp.einsum("oc,bchw->bohw", cls_w, x, precision=hi)
            + p["cls_b"][None, :, None, None])
    s1 = p["bn1_g"] / jnp.sqrt(p["bn1_v"] + eps)
    t1 = p["bn1_b"] - p["bn1_m"] * s1
    ctx = jax.nn.relu(
        (mask * p["ctx_w"][:, 0, 0, 0][None, :, None, None]
         + p["ctx_b"][None, :, None, None])
        * s1[None, :, None, None] + t1[None, :, None, None])
    x2 = jax.lax.conv_general_dilated(
        x, p["w3"], (1, 1), "SAME",
        dimension_numbers=("NCHW", "OIHW", "NCHW"), precision=hi)
    x2 = x2 + p["b3"][None, :, None, None]
    s2 = p["bn2_g"] / jnp.sqrt(p["bn2_v"] + eps)
    t2 = p["bn2_b"] - p["bn2_m"] * s2
    x2 = x2 * s2[None, :, None, None] + t2[None, :, None, None]
    pooled = jnp.mean(x, axis=(2, 3))                                # (B, C)
    sse_w = p["sse_w"][:, :, 0, 0]                                   # (out, in)
    gate = jax.nn.sigmoid(pooled @ sse_w.T + p["sse_b"])
    x3 = x * gate[:, :, None, None]
    return x2 + x3 + ctx, mask


if __name__ == "__main__":
    B, C, H, W = 2, 32, 16, 16          # mid_d = 32
    key = jax.random.PRNGKey(0)
    k_x, k_p = jax.random.split(key)

    # Native PyTorch NCHW input — no host-side transpose needed anymore.
    x_nchw = jax.random.normal(k_x, (B, C, H, W), jnp.float32)
    params = make_params(k_p, C)
    kp = fold_params(params)

    # f32 path; batch_block auto-selected (1 step on v5e/v6e, 2 steps on v7x).
    x_out, mask = jax.block_until_ready(supervised_attention_forward(x_nchw, kp))
    ref_out, ref_mask = reference(x_nchw, params)
    assert np.allclose(np.asarray(x_out), np.asarray(ref_out), atol=1e-2, rtol=1e-2)
    assert np.allclose(np.asarray(mask), np.asarray(ref_mask), atol=1e-2, rtol=1e-2)

    # bf16 MXU-operand knob (v6e/v7x): validated against the f32 Pallas kernel.
    x_out16, mask16 = jax.block_until_ready(
        supervised_attention_forward(x_nchw, kp, use_bf16=True))
    assert np.allclose(np.asarray(x_out16), np.asarray(x_out), atol=1e-1, rtol=1e-1)
    assert np.allclose(np.asarray(mask16), np.asarray(mask), atol=1e-1, rtol=1e-1)

    print("KERNEL_OK")
</pallas_src>

<mosaic_0001>
module attributes {stable_mosaic.version = 11 : i64} {
  func.func @kernel(%arg0: i32, %arg1: memref<2x32x256xf32, #tpu.memory_space<vmem>>, %arg2: memref<80x96xf32, #tpu.memory_space<vmem>>, %arg3: memref<2x32x96xf32, #tpu.memory_space<vmem>>, %arg4: memref<1xf32, #tpu.memory_space<smem>>, %arg5: memref<32x1xf32, #tpu.memory_space<vmem>>, %arg6: memref<32x1xf32, #tpu.memory_space<vmem>>, %arg7: memref<32x32xf32, #tpu.memory_space<vmem>>, %arg8: memref<32x1xf32, #tpu.memory_space<vmem>>, %arg9: memref<2x32x256xf32, #tpu.memory_space<vmem>>, %arg10: memref<2x1x256xf32, #tpu.memory_space<vmem>>) attributes {dimension_semantics = [#tpu.dimension_semantics<parallel>], iteration_bounds = array<i64: 1>, scalar_prefetch = 0 : i64, scratch_operands = 0 : i64, tpu.core_type = #tpu.core_type<tc>, window_params = [{transform_indices = @transform_0, window_bounds = array<i64: 2, 32, 256>}, {pipeline_mode = #tpu.pipeline_mode<synchronous>, transform_indices = @transform_1, window_bounds = array<i64: 80, 96>}, {pipeline_mode = #tpu.pipeline_mode<synchronous>, transform_indices = @transform_2, window_bounds = array<i64: 2, 32, 96>}, {transform_indices = @transform_3, window_bounds = array<i64: 1>}, {pipeline_mode = #tpu.pipeline_mode<synchronous>, transform_indices = @transform_4, window_bounds = array<i64: 32, 1>}, {pipeline_mode = #tpu.pipeline_mode<synchronous>, transform_indices = @transform_5, window_bounds = array<i64: 32, 1>}, {pipeline_mode = #tpu.pipeline_mode<synchronous>, transform_indices = @transform_6, window_bounds = array<i64: 32, 32>}, {pipeline_mode = #tpu.pipeline_mode<synchronous>, transform_indices = @transform_7, window_bounds = array<i64: 32, 1>}, {transform_indices = @transform_8, window_bounds = array<i64: 2, 32, 256>}, {transform_indices = @transform_9, window_bounds = array<i64: 2, 1, 256>}]} {
    %0 = tpu.iota {dimensions = array<i32: 1>} : vector<1x256xi32>
    %c16_i32 = arith.constant 16 : i32
    %c0_i32 = arith.constant 0 : i32
    %1 = arith.cmpi eq, %c16_i32, %c0_i32 : i32
    %c1_i32 = arith.constant 1 : i32
    %2 = arith.select %1, %c1_i32, %c16_i32 : i32
    %3 = vector.broadcast %2 : i32 to vector<1x256xi32>
    %4 = arith.remsi %0, %3 : vector<1x256xi32>
    %c0_i32_0 = arith.constant 0 : i32
    %5 = vector.broadcast %c0_i32_0 : i32 to vector<1x256xi32>
    %6 = arith.cmpi ne, %4, %5 : vector<1x256xi32>
    %c0_i32_1 = arith.constant 0 : i32
    %7 = vector.broadcast %c0_i32_1 : i32 to vector<1x256xi32>
    %8 = arith.cmpi slt, %4, %7 : vector<1x256xi32>
    %c0_i32_2 = arith.constant 0 : i32
    %9 = arith.cmpi slt, %2, %c0_i32_2 : i32
    %10 = vector.broadcast %9 : i1 to vector<1x256xi1>
    %11 = vector.broadcast %10 : vector<1x256xi1> to vector<1x256xi1>
    %12 = arith.xori %8, %11 : vector<1x256xi1>
    %13 = arith.andi %12, %6 : vector<1x256xi1>
    %14 = vector.broadcast %2 : i32 to vector<1x256xi32>
    %15 = arith.addi %4, %14 : vector<1x256xi32>
    %16 = arith.select %13, %15, %4 : vector<1x256xi1>, vector<1x256xi32>
    %c0_i32_3 = arith.constant 0 : i32
    %17 = vector.broadcast %c0_i32_3 : i32 to vector<1x256xi32>
    %18 = arith.cmpi ne, %16, %17 : vector<1x256xi32>
    %19 = vector.shape_cast %18 : vector<1x256xi1> to vector<1x256xi1>
    %20 = vector.broadcast %19 : vector<1x256xi1> to vector<32x256xi1>
    %c15_i32 = arith.constant 15 : i32
    %21 = vector.broadcast %c15_i32 : i32 to vector<1x256xi32>
    %22 = arith.cmpi ne, %16, %21 : vector<1x256xi32>
    %23 = vector.shape_cast %22 : vector<1x256xi1> to vector<1x256xi1>
    %24 = vector.broadcast %23 : vector<1x256xi1> to vector<32x256xi1>
    %c16_i32_4 = arith.constant 16 : i32
    %25 = vector.broadcast %c16_i32_4 : i32 to vector<1x256xi32>
    %26 = arith.cmpi sge, %0, %25 : vector<1x256xi32>
    %27 = vector.shape_cast %26 : vector<1x256xi1> to vector<1x256xi1>
    %28 = vector.broadcast %27 : vector<1x256xi1> to vector<32x256xi1>
    %c240_i32 = arith.constant 240 : i32
    %29 = vector.broadcast %c240_i32 : i32 to vector<1x256xi32>
    %30 = arith.cmpi slt, %0, %29 : vector<1x256xi32>
    %31 = vector.shape_cast %30 : vector<1x256xi1> to vector<1x256xi1>
    %32 = vector.broadcast %31 : vector<1x256xi1> to vector<32x256xi1>
    %c0 = arith.constant 0 : index
    %c0_5 = arith.constant 0 : index
    %33 = vector.load %arg2[%c0, %c0_5] : memref<80x96xf32, #tpu.memory_space<vmem>>, vector<80x96xf32>
    %c0_6 = arith.constant 0 : index
    %c0_7 = arith.constant 0 : index
    %c0_8 = arith.constant 0 : index
    %34 = vector.load %arg3[%c0_6, %c0_7, %c0_8] : memref<2x32x96xf32, #tpu.memory_space<vmem>>, vector<1x32x96xf32>
    %35 = vector.shape_cast %34 : vector<1x32x96xf32> to vector<32x96xf32>
    %c1 = arith.constant 1 : index
    %c0_9 = arith.constant 0 : index
    %c0_10 = arith.constant 0 : index
    %36 = vector.load %arg3[%c1, %c0_9, %c0_10] : memref<2x32x96xf32, #tpu.memory_space<vmem>>, vector<1x32x96xf32>
    %37 = vector.shape_cast %36 : vector<1x32x96xf32> to vector<32x96xf32>
    %c0_11 = arith.constant 0 : index
    %38 = memref.load %arg4[%c0_11] : memref<1xf32, #tpu.memory_space<smem>>
    %c0_12 = arith.constant 0 : index
    %c0_13 = arith.constant 0 : index
    %39 = vector.load %arg5[%c0_12, %c0_13] : memref<32x1xf32, #tpu.memory_space<vmem>>, vector<32x1xf32>
    %40 = vector.shape_cast %39 : vector<32x1xf32> to vector<32x1xf32>
    %41 = vector.broadcast %40 : vector<32x1xf32> to vector<32x256xf32>
    %c0_14 = arith.constant 0 : index
    %c0_15 = arith.constant 0 : index
    %42 = vector.load %arg6[%c0_14, %c0_15] : memref<32x1xf32, #tpu.memory_space<vmem>>, vector<32x1xf32>
    %43 = vector.shape_cast %42 : vector<32x1xf32> to vector<32x1xf32>
    %44 = vector.broadcast %43 : vector<32x1xf32> to vector<32x256xf32>
    %c0_16 = arith.constant 0 : index
    %c0_17 = arith.constant 0 : index
    %45 = vector.load %arg7[%c0_16, %c0_17] : memref<32x32xf32, #tpu.memory_space<vmem>>, vector<32x32xf32>
    %c0_18 = arith.constant 0 : index
    %c0_19 = arith.constant 0 : index
    %46 = vector.load %arg8[%c0_18, %c0_19] : memref<32x1xf32, #tpu.memory_space<vmem>>, vector<32x1xf32>
    %c0_20 = arith.constant 0 : index
    %c0_21 = arith.constant 0 : index
    %c0_22 = arith.constant 0 : index
    %47 = vector.load %arg1[%c0_20, %c0_21, %c0_22] : memref<2x32x256xf32, #tpu.memory_space<vmem>>, vector<1x32x256xf32>
    %48 = vector.shape_cast %47 : vector<1x32x256xf32> to vector<32x256xf32>
    %cst = arith.constant dense<0.000000e+00> : vector<32xf32>
    %49 = vector.multi_reduction <add>, %48, %cst [1] : vector<32x256xf32> to vector<32xf32>
    %50 = vector.shape_cast %49 : vector<32xf32> to vector<32x1xf32>
    %cst_23 = arith.constant 2.560000e+02 : f32
    %51 = vector.broadcast %cst_23 : f32 to vector<32x1xf32>
    %52 = arith.divf %50, %51 : vector<32x1xf32>
    %cst_24 = arith.constant dense<0.000000e+00> : vector<32x1xf32>
    %53 = tpu.matmul %45, %52, %cst_24 {dimension_numbers = #tpu.dot_dimension_numbers<[1], [0], [0], [1], [0, 0, 1, 1], [], []>} : vector<32x32xf32>, vector<32x1xf32>, vector<32x1xf32> -> vector<32x1xf32>
    %54 = arith.addf %53, %46 : vector<32x1xf32>
    %55 = arith.negf %54 : vector<32x1xf32>
    %56 = math.exp %55 : vector<32x1xf32>
    %cst_25 = arith.constant 1.000000e+00 : f32
    %57 = vector.broadcast %cst_25 : f32 to vector<32x1xf32>
    %58 = arith.addf %57, %56 : vector<32x1xf32>
    %59 = arith.divf %57, %58 : vector<32x1xf32>
    %60 = vector.broadcast %59 : vector<32x1xf32> to vector<32x256xf32>
    %61 = arith.mulf %48, %60 : vector<32x256xf32>
    %c16_i32_26 = arith.constant 16 : i32
    %62 = tpu.dynamic_rotate %48 by %c16_i32_26 dim 1 : vector<32x256xf32>, i32 -> vector<32x256xf32>
    %cst_27 = arith.constant 0.000000e+00 : f32
    %63 = vector.broadcast %cst_27 : f32 to vector<32x256xf32>
    %64 = arith.select %28, %62, %63 : vector<32x256xi1>, vector<32x256xf32>
    %c240_i32_28 = arith.constant 240 : i32
    %65 = tpu.dynamic_rotate %48 by %c240_i32_28 dim 1 : vector<32x256xf32>, i32 -> vector<32x256xf32>
    %cst_29 = arith.constant 0.000000e+00 : f32
    %66 = vector.broadcast %cst_29 : f32 to vector<32x256xf32>
    %67 = arith.select %32, %65, %66 : vector<32x256xi1>, vector<32x256xf32>
    %68 = tpu.concatenate %64, %48, %67 in 0 : vector<32x256xf32>, vector<32x256xf32>, vector<32x256xf32> -> vector<96x256xf32>
    %cst_30 = arith.constant dense<0.000000e+00> : vector<80x256xf32>
    %69 = tpu.matmul %33, %68, %cst_30 {dimension_numbers = #tpu.dot_dimension_numbers<[1], [0], [0], [1], [0, 0, 1, 1], [], []>} : vector<80x96xf32>, vector<96x256xf32>, vector<80x256xf32> -> vector<80x256xf32>
    %70 = vector.extract_strided_slice %69 {offsets = [0, 0], sizes = [32, 256], strides = [1, 1]} : vector<80x256xf32> to vector<32x256xf32>
    %71 = vector.extract_strided_slice %69 {offsets = [32, 0], sizes = [32, 256], strides = [1, 1]} : vector<80x256xf32> to vector<32x256xf32>
    %72 = arith.addf %71, %41 : vector<32x256xf32>
    %cst_31 = arith.constant 0.000000e+00 : f32
    %73 = vector.broadcast %cst_31 : f32 to vector<32x256xf32>
    %74 = arith.maximumf %72, %73 : vector<32x256xf32>
    %75 = vector.extract_strided_slice %69 {offsets = [64, 0], sizes = [1, 256], strides = [1, 1]} : vector<80x256xf32> to vector<1x256xf32>
    %76 = vector.broadcast %38 : f32 to vector<1x256xf32>
    %77 = arith.addf %75, %76 : vector<1x256xf32>
    %c0_32 = arith.constant 0 : index
    %c0_33 = arith.constant 0 : index
    %c0_34 = arith.constant 0 : index
    %78 = vector.load %arg10[%c0_32, %c0_33, %c0_34] : memref<2x1x256xf32, #tpu.memory_space<vmem>>, vector<1x1x256xf32>
    %79 = vector.shape_cast %78 : vector<1x1x256xf32> to vector<1x256xf32>
    %80 = vector.shape_cast %77 : vector<1x256xf32> to vector<1x1x256xf32>
    tpu.vector_store %arg10[%c0_32, %c0_33, %c0_34], %80 {strides = array<i32>} : memref<2x1x256xf32, #tpu.memory_space<vmem>>, vector<1x1x256xf32>,
    %c1_i32_35 = arith.constant 1 : i32
    %81 = tpu.dynamic_rotate %68 by %c1_i32_35 dim 1 : vector<96x256xf32>, i32 -> vector<96x256xf32>
    %cst_36 = arith.constant dense<0.000000e+00> : vector<32x256xf32>
    %82 = tpu.matmul %35, %81, %cst_36 {dimension_numbers = #tpu.dot_dimension_numbers<[1], [0], [0], [1], [0, 0, 1, 1], [], []>} : vector<32x96xf32>, vector<96x256xf32>, vector<32x256xf32> -> vector<32x256xf32>
    %cst_37 = arith.constant 0.000000e+00 : f32
    %83 = vector.broadcast %cst_37 : f32 to vector<32x256xf32>
    %84 = arith.select %20, %82, %83 : vector<32x256xi1>, vector<32x256xf32>
    %85 = arith.addf %70, %84 : vector<32x256xf32>
    %c255_i32 = arith.constant 255 : i32
    %86 = tpu.dynamic_rotate %68 by %c255_i32 dim 1 : vector<96x256xf32>, i32 -> vector<96x256xf32>
    %cst_38 = arith.constant dense<0.000000e+00> : vector<32x256xf32>
    %87 = tpu.matmul %37, %86, %cst_38 {dimension_numbers = #tpu.dot_dimension_numbers<[1], [0], [0], [1], [0, 0, 1, 1], [], []>} : vector<32x96xf32>, vector<96x256xf32>, vector<32x256xf32> -> vector<32x256xf32>
    %cst_39 = arith.constant 0.000000e+00 : f32
    %88 = vector.broadcast %cst_39 : f32 to vector<32x256xf32>
    %89 = arith.select %24, %87, %88 : vector<32x256xi1>, vector<32x256xf32>
    %90 = arith.addf %85, %89 : vector<32x256xf32>
    %91 = arith.addf %90, %44 : vector<32x256xf32>
    %92 = arith.addf %91, %61 : vector<32x256xf32>
    %93 = arith.addf %92, %74 : vector<32x256xf32>
    %c0_40 = arith.constant 0 : index
    %c0_41 = arith.constant 0 : index
    %c0_42 = arith.constant 0 : index
    %94 = vector.load %arg9[%c0_40, %c0_41, %c0_42] : memref<2x32x256xf32, #tpu.memory_space<vmem>>, vector<1x32x256xf32>
    %95 = vector.shape_cast %94 : vector<1x32x256xf32> to vector<32x256xf32>
    %96 = vector.shape_cast %93 : vector<32x256xf32> to vector<1x32x256xf32>
    tpu.vector_store %arg9[%c0_40, %c0_41, %c0_42], %96 {strides = array<i32>} : memref<2x32x256xf32, #tpu.memory_space<vmem>>, vector<1x32x256xf32>,
    %c1_43 = arith.constant 1 : index
    %c0_44 = arith.constant 0 : index
    %c0_45 = arith.constant 0 : index
    %97 = vector.load %arg1[%c1_43, %c0_44, %c0_45] : memref<2x32x256xf32, #tpu.memory_space<vmem>>, vector<1x32x256xf32>
    %98 = vector.shape_cast %97 : vector<1x32x256xf32> to vector<32x256xf32>
    %cst_46 = arith.constant dense<0.000000e+00> : vector<32xf32>
    %99 = vector.multi_reduction <add>, %98, %cst_46 [1] : vector<32x256xf32> to vector<32xf32>
    %100 = vector.shape_cast %99 : vector<32xf32> to vector<32x1xf32>
    %cst_47 = arith.constant 2.560000e+02 : f32
    %101 = vector.broadcast %cst_47 : f32 to vector<32x1xf32>
    %102 = arith.divf %100, %101 : vector<32x1xf32>
    %cst_48 = arith.constant dense<0.000000e+00> : vector<32x1xf32>
    %103 = tpu.matmul %45, %102, %cst_48 {dimension_numbers = #tpu.dot_dimension_numbers<[1], [0], [0], [1], [0, 0, 1, 1], [], []>} : vector<32x32xf32>, vector<32x1xf32>, vector<32x1xf32> -> vector<32x1xf32>
    %104 = arith.addf %103, %46 : vector<32x1xf32>
    %105 = arith.negf %104 : vector<32x1xf32>
    %106 = math.exp %105 : vector<32x1xf32>
    %cst_49 = arith.constant 1.000000e+00 : f32
    %107 = vector.broadcast %cst_49 : f32 to vector<32x1xf32>
    %108 = arith.addf %107, %106 : vector<32x1xf32>
    %109 = arith.divf %107, %108 : vector<32x1xf32>
    %110 = vector.broadcast %109 : vector<32x1xf32> to vector<32x256xf32>
    %111 = arith.mulf %98, %110 : vector<32x256xf32>
    %c16_i32_50 = arith.constant 16 : i32
    %112 = tpu.dynamic_rotate %98 by %c16_i32_50 dim 1 : vector<32x256xf32>, i32 -> vector<32x256xf32>
    %cst_51 = arith.constant 0.000000e+00 : f32
    %113 = vector.broadcast %cst_51 : f32 to vector<32x256xf32>
    %114 = arith.select %28, %112, %113 : vector<32x256xi1>, vector<32x256xf32>
    %c240_i32_52 = arith.constant 240 : i32
    %115 = tpu.dynamic_rotate %98 by %c240_i32_52 dim 1 : vector<32x256xf32>, i32 -> vector<32x256xf32>
    %cst_53 = arith.constant 0.000000e+00 : f32
    %116 = vector.broadcast %cst_53 : f32 to vector<32x256xf32>
    %117 = arith.select %32, %115, %116 : vector<32x256xi1>, vector<32x256xf32>
    %118 = tpu.concatenate %114, %98, %117 in 0 : vector<32x256xf32>, vector<32x256xf32>, vector<32x256xf32> -> vector<96x256xf32>
    %cst_54 = arith.constant dense<0.000000e+00> : vector<80x256xf32>
    %119 = tpu.matmul %33, %118, %cst_54 {dimension_numbers = #tpu.dot_dimension_numbers<[1], [0], [0], [1], [0, 0, 1, 1], [], []>} : vector<80x96xf32>, vector<96x256xf32>, vector<80x256xf32> -> vector<80x256xf32>
    %120 = vector.extract_strided_slice %119 {offsets = [0, 0], sizes = [32, 256], strides = [1, 1]} : vector<80x256xf32> to vector<32x256xf32>
    %121 = vector.extract_strided_slice %119 {offsets = [32, 0], sizes = [32, 256], strides = [1, 1]} : vector<80x256xf32> to vector<32x256xf32>
    %122 = arith.addf %121, %41 : vector<32x256xf32>
    %cst_55 = arith.constant 0.000000e+00 : f32
    %123 = vector.broadcast %cst_55 : f32 to vector<32x256xf32>
    %124 = arith.maximumf %122, %123 : vector<32x256xf32>
    %125 = vector.extract_strided_slice %119 {offsets = [64, 0], sizes = [1, 256], strides = [1, 1]} : vector<80x256xf32> to vector<1x256xf32>
    %126 = vector.broadcast %38 : f32 to vector<1x256xf32>
    %127 = arith.addf %125, %126 : vector<1x256xf32>
    %c1_56 = arith.constant 1 : index
    %c0_57 = arith.constant 0 : index
    %c0_58 = arith.constant 0 : index
    %128 = vector.load %arg10[%c1_56, %c0_57, %c0_58] : memref<2x1x256xf32, #tpu.memory_space<vmem>>, vector<1x1x256xf32>
    %129 = vector.shape_cast %128 : vector<1x1x256xf32> to vector<1x256xf32>
    %130 = vector.shape_cast %127 : vector<1x256xf32> to vector<1x1x256xf32>
    tpu.vector_store %arg10[%c1_56, %c0_57, %c0_58], %130 {strides = array<i32>} : memref<2x1x256xf32, #tpu.memory_space<vmem>>, vector<1x1x256xf32>,
    %c1_i32_59 = arith.constant 1 : i32
    %131 = tpu.dynamic_rotate %118 by %c1_i32_59 dim 1 : vector<96x256xf32>, i32 -> vector<96x256xf32>
    %cst_60 = arith.constant dense<0.000000e+00> : vector<32x256xf32>
    %132 = tpu.matmul %35, %131, %cst_60 {dimension_numbers = #tpu.dot_dimension_numbers<[1], [0], [0], [1], [0, 0, 1, 1], [], []>} : vector<32x96xf32>, vector<96x256xf32>, vector<32x256xf32> -> vector<32x256xf32>
    %cst_61 = arith.constant 0.000000e+00 : f32
    %133 = vector.broadcast %cst_61 : f32 to vector<32x256xf32>
    %134 = arith.select %20, %132, %133 : vector<32x256xi1>, vector<32x256xf32>
    %135 = arith.addf %120, %134 : vector<32x256xf32>
    %c255_i32_62 = arith.constant 255 : i32
    %136 = tpu.dynamic_rotate %118 by %c255_i32_62 dim 1 : vector<96x256xf32>, i32 -> vector<96x256xf32>
    %cst_63 = arith.constant dense<0.000000e+00> : vector<32x256xf32>
    %137 = tpu.matmul %37, %136, %cst_63 {dimension_numbers = #tpu.dot_dimension_numbers<[1], [0], [0], [1], [0, 0, 1, 1], [], []>} : vector<32x96xf32>, vector<96x256xf32>, vector<32x256xf32> -> vector<32x256xf32>
    %cst_64 = arith.constant 0.000000e+00 : f32
    %138 = vector.broadcast %cst_64 : f32 to vector<32x256xf32>
    %139 = arith.select %24, %137, %138 : vector<32x256xi1>, vector<32x256xf32>
    %140 = arith.addf %135, %139 : vector<32x256xf32>
    %141 = arith.addf %140, %44 : vector<32x256xf32>
    %142 = arith.addf %141, %111 : vector<32x256xf32>
    %143 = arith.addf %142, %124 : vector<32x256xf32>
    %c1_65 = arith.constant 1 : index
    %c0_66 = arith.constant 0 : index
    %c0_67 = arith.constant 0 : index
    %144 = vector.load %arg9[%c1_65, %c0_66, %c0_67] : memref<2x32x256xf32, #tpu.memory_space<vmem>>, vector<1x32x256xf32>
    %145 = vector.shape_cast %144 : vector<1x32x256xf32> to vector<32x256xf32>
    %146 = vector.shape_cast %143 : vector<32x256xf32> to vector<1x32x256xf32>
    tpu.vector_store %arg9[%c1_65, %c0_66, %c0_67], %146 {strides = array<i32>} : memref<2x32x256xf32, #tpu.memory_space<vmem>>, vector<1x32x256xf32>,
    return
  }
  func.func @transform_0(%arg0: i32) -> (i32, i32, i32) {
    %c0_i32 = arith.constant 0 : i32
    %c0_i32_0 = arith.constant 0 : i32
    %c0_i32_1 = arith.constant 0 : i32
    return %arg0, %c0_i32, %c0_i32_0 : i32, i32, i32
  }
  func.func @transform_1(%arg0: i32) -> (i32, i32) {
    %c0_i32 = arith.constant 0 : i32
    %c0_i32_0 = arith.constant 0 : i32
    %c0_i32_1 = arith.constant 0 : i32
    return %c0_i32, %c0_i32_0 : i32, i32
  }
  func.func @transform_2(%arg0: i32) -> (i32, i32, i32) {
    %c0_i32 = arith.constant 0 : i32
    %c0_i32_0 = arith.constant 0 : i32
    %c0_i32_1 = arith.constant 0 : i32
    %c0_i32_2 = arith.constant 0 : i32
    return %c0_i32, %c0_i32_0, %c0_i32_1 : i32, i32, i32
  }
  func.func @transform_3(%arg0: i32) -> i32 {
    %c0_i32 = arith.constant 0 : i32
    %c0_i32_0 = arith.constant 0 : i32
    return %c0_i32 : i32
  }
  func.func @transform_4(%arg0: i32) -> (i32, i32) {
    %c0_i32 = arith.constant 0 : i32
    %c0_i32_0 = arith.constant 0 : i32
    %c0_i32_1 = arith.constant 0 : i32
    return %c0_i32, %c0_i32_0 : i32, i32
  }
  func.func @transform_5(%arg0: i32) -> (i32, i32) {
    %c0_i32 = arith.constant 0 : i32
    %c0_i32_0 = arith.constant 0 : i32
    %c0_i32_1 = arith.constant 0 : i32
    return %c0_i32, %c0_i32_0 : i32, i32
  }
  func.func @transform_6(%arg0: i32) -> (i32, i32) {
    %c0_i32 = arith.constant 0 : i32
    %c0_i32_0 = arith.constant 0 : i32
    %c0_i32_1 = arith.constant 0 : i32
    return %c0_i32, %c0_i32_0 : i32, i32
  }
  func.func @transform_7(%arg0: i32) -> (i32, i32) {
    %c0_i32 = arith.constant 0 : i32
    %c0_i32_0 = arith.constant 0 : i32
    %c0_i32_1 = arith.constant 0 : i32
    return %c0_i32, %c0_i32_0 : i32, i32
  }
  func.func @transform_8(%arg0: i32) -> (i32, i32, i32) {
    %c0_i32 = arith.constant 0 : i32
    %c0_i32_0 = arith.constant 0 : i32
    %c0_i32_1 = arith.constant 0 : i32
    return %arg0, %c0_i32, %c0_i32_0 : i32, i32, i32
  }
  func.func @transform_9(%arg0: i32) -> (i32, i32, i32) {
    %c0_i32 = arith.constant 0 : i32
    %c0_i32_0 = arith.constant 0 : i32
    %c0_i32_1 = arith.constant 0 : i32
    return %arg0, %c0_i32, %c0_i32_0 : i32, i32, i32
  }
}

</mosaic_0001>

<bundles_post_ra>
// kernel: supervised_attention_forward.1
= control target key start
LH: loop header
LB: loop body
LE: loop exit
PB: predicated region body
PF: predicated region fallthrough
CT: control target
= control target key end

     0   :  { %s2016_s13 = smov 112   ;;  %s2017_s26 = smov 16   ;;  %v2018_v18 = vmov 0.0   ;;  %vm184_vm0 = vcmask 261120   ;;  %v32_v20 = vlaneseq  ;;  %vm400_vm5 = vcmask 785408   ;;  %s3561_s0 = inlined_call_operand.vmem [shape: f32[2,32,256], index: 0, kind: input, shape index: {}]   ;;  %s3562_s6 = inlined_call_operand.vmem [shape: f32[32,32], index: 6, kind: input, shape index: {}]   ;;  %s3563_s1 = inlined_call_operand.vmem [shape: f32[80,96], index: 1, kind: input, shape index: {}]   ;;  %s3564_s2 = inlined_call_operand.vmem [shape: f32[2,32,96], index: 2, kind: input, shape index: {}]   ;;  %s3565_s3 = inlined_call_operand.<no memory space> [shape: f32[1], index: 3, kind: input, shape index: {}]   ;;  %s3566_s4 = inlined_call_operand.vmem [shape: f32[32,1], index: 4, kind: input, shape index: {}]   ;;  %s3567_s9 = inlined_call_operand.vmem [shape: f32[2,1,256], index: 9, kind: output, shape index: {1}]   ;;  %s3568_s5 = inlined_call_operand.vmem [shape: f32[32,1], index: 5, kind: input, shape index: {}]   ;;  %s3569_s7 = inlined_call_operand.vmem [shape: f32[32,1], index: 7, kind: input, shape index: {}]   ;;  %s3570_s8 = inlined_call_operand.vmem [shape: f32[2,32,256], index: 8, kind: output, shape index: {0}]  }
   0x1   :  { %v2076_v0 = vld [vmem:[%s3561_s0 + $0x30] sm:$0xff]  ;;  %v2081_v1 = vld [vmem:[%s3561_s0 + $0x20] sm:$0xff]  ;;  %v2090_v2 = vld [vmem:[%s3561_s0 + $0x38] sm:$0xff]  ;;  %495 = vmatprep.mubr.f32.mxu1 %v2018_v18  ;;  %s2019_s25 = smov 1  }
   0x2   :  { %373 = vrot.lane.b32.xlu0 %v2076_v0, %s2016_s13  ;;  %371 = vrot.lane.b32.xlu1 %v2081_v1, %s2016_s13  ;;  %v2095_v3 = vld [vmem:[%s3561_s0 + $0x28] sm:$0xff]  ;;  %v2104_v4 = vld [vmem:[%s3561_s0 + $0x18] sm:$0xff]  ;;  %v176_v8 = vadd.f32 %v2090_v2, %v2076_v0  ;;  %v2194_v21 = vand.u32 127, %v32_v20  ;;  %vm2935_vm8 = vcmp.lt.s32.totalorder %v32_v20, 256 }
   0x3   :  { %v2109_v5 = vld [vmem:[%s3561_s0 + $0x10] sm:$0xff]  ;;  %v2118_v6 = vld [vmem:[%s3561_s0 + $0x8] sm:$0xff]  ;;  %v2123_v7 = vld [vmem:[%s3561_s0] sm:$0xff]  ;;  %v173_v10 = vadd.f32 %v2095_v3, %v2081_v1 }
   0x4   :  { %v170_v9 = vadd.f32 %v2104_v4, %v2109_v5  ;;  %v2154_v11 = vld [vmem:[%s3561_s0 + $0x70] sm:$0xff]  ;;  %v2159_v12 = vld [vmem:[%s3561_s0 + $0x78] sm:$0xff]  ;;  %v167_v13 = vadd.f32 %v2118_v6, %v2123_v7  ;;  %v2168_v15 = vld [vmem:[%s3561_s0 + $0x60] sm:$0xff]  ;;  %v2197_v22 = vadd.s32 128, %v2194_v21  ;;  %vm383_vm1 = vcmp.lt.s32.totalorder %v2194_v21, 112 }
   0x5   :  { %v1026_v14 = vadd.f32 %v2159_v12, %v2154_v11  ;;  %v2173_v16 = vld [vmem:[%s3561_s0 + $0x68] sm:$0xff]  ;;  %v2189_v19 = vld [vmem:[%s3562_s6] sm:$0xff]  ;;  %v2202_v25 = vld [vmem:[%s3561_s0 + $0x50] sm:$0xff]  ;;  %vm350_vm3 = vcmp.lt.s32.totalorder %v2194_v21, 16  ;;  %vm71_vm4 = vcmp.ge.s32.totalorder %v2194_v21, 16  ;;  %vm644_vm6 = vcmp.lt.s32.totalorder %v2194_v21, 1 }
   0x6   :  { %381 = vrot.lane.b32.xlu0 %v2090_v2, %s2016_s13  ;;  %379 = vrot.lane.b32.xlu1 %v2095_v3, %s2016_s13  ;;  %v1023_v17 = vadd.f32 %v2173_v16, %v2168_v15  ;;  %v2207_v26 = vld [vmem:[%s3561_s0 + $0x58] sm:$0xff]  ;;  %vm78_vm2 = vcmp.lt.s32.totalorder %v2197_v22, 240  ;;  %v2252_v38 = vld [vmem:[%s3561_s0 + $0x40] sm:$0xff]  ;;  %vm834_vm7 = vcmp.lt.s32.totalorder %v2194_v21, 127 }
   0x7   :  { %1903 = vmatprep.mubr.msk.f32.mxu0 %vm184_vm0, %v2189_v19  ;;  %v1020_v27 = vadd.f32 %v2207_v26, %v2202_v25  ;;  %v2257_v39 = vld [vmem:[%s3561_s0 + $0x48] sm:$0xff]  ;;  %v83_v61 = vld [vmem:[%s3563_s1] sm:$0xff] }
   0x8   :  { %v1017_v44 = vadd.f32 %v2257_v39, %v2252_v38 }
   0xa   :  { %377 = vrot.lane.b32.xlu1 %v2104_v4, %s2016_s13  ;;  %369 = vrot.lane.b32.xlu0 %v2109_v5, %s2016_s13 }
   0xe   :  { %375 = vrot.lane.b32.xlu1 %v2118_v6, %s2016_s13  ;;  %367 = vrot.lane.b32.xlu0 %v2123_v7, %s2016_s13 }
  0x12   :  { %348 = vrot.lane.b32.xlu1 %v2090_v2, %s2017_s26  ;;  %340 = vrot.lane.b32.xlu0 %v2076_v0, %s2017_s26 }
  0x16   :  { %346 = vrot.lane.b32.xlu1 %v2095_v3, %s2017_s26  ;;  %338 = vrot.lane.b32.xlu0 %v2081_v1, %s2017_s26 }
  0x1a   :  { %344 = vrot.lane.b32.xlu1 %v2104_v4, %s2017_s26  ;;  %336 = vrot.lane.b32.xlu0 %v2109_v5, %s2017_s26 }
  0x1e   :  { %342 = vrot.lane.b32.xlu1 %v2118_v6, %s2017_s26  ;;  %334 = vrot.lane.b32.xlu0 %v2123_v7, %s2017_s26 }
  0x3d   :  { %177 = vadd.xlane.f32.xlu0 %v176_v8  ;;  %v84_v8 = vld [vmem:[%s3563_s1 + $0x8] sm:$0xff] }
  0x41   :  { %171 = vadd.xlane.f32.xlu0 %v170_v9  ;;  %v85_v9 = vld [vmem:[%s3563_s1 + $0x10] sm:$0xff] }
  0x42   :  { %174 = vadd.xlane.f32.xlu1 %v173_v10 }
  0x45   :  { %168 = vadd.xlane.f32.xlu0 %v167_v13  ;;  %v86_v13 = vld [vmem:[%s3563_s1 + $0x18] sm:$0xff] }
  0x46   :  { %1027 = vadd.xlane.f32.xlu1 %v1026_v14 }
  0x49   :  { %1024 = vadd.xlane.f32.xlu0 %v1023_v17  ;;  %v87_v17 = vld [vmem:[%s3563_s1 + $0x20] sm:$0xff] }
  0x57   :  { %1208 = vrot.lane.b32.xlu1 %v2154_v11, %s2016_s13 }
  0x5f   :  { %1216 = vrot.lane.b32.xlu0 %v2159_v12, %s2016_s13 }
  0x63   :  { %1206 = vrot.lane.b32.xlu0 %v2168_v15, %s2016_s13 }
  0x67   :  { %1214 = vrot.lane.b32.xlu0 %v2173_v16, %s2016_s13 }
  0x74   :  { %v374_v23 = vpop.permute.xlu0 %373  ;;  %v372_v24 = vpop.permute.xlu1 %371 }
  0x78   :  { %v382_v28 = vpop.permute.xlu0 %381  ;;  %v380_v29 = vpop.permute.xlu1 %379 }
  0x79   :  { %v2215_v30 = vsel %vm383_vm1, %v382_v28, %v374_v23  ;;  %v2219_v31 = vsel %vm383_vm1, %v374_v23, %v382_v28  ;;  %v2227_v32 = vsel %vm383_vm1, %v380_v29, %v372_v24  ;;  %v2234_v35 = vsel %vm383_vm1, %v372_v24, %v380_v29  ;;  %v88_v23 = vld [vmem:[%s3563_s1 + $0x28] sm:$0xff]  ;;  %v89_v24 = vld [vmem:[%s3563_s1 + $0x30] sm:$0xff]  ;;  %v91_v28 = vld [vmem:[%s3563_s1 + $0x40] sm:$0xff] }
  0x7a   :  { %1802 = vmatprep.subr.msk.mxu1 %vm78_vm2, %v2215_v30  ;;  %v2347_v62 = vsel %vm78_vm2, %v2215_v30, 0.0  ;;  %v2352_v63 = vsel %vm78_vm2, %v2227_v32, 0.0  ;;  %v92_v29 = vld [vmem:[%s3563_s1 + $0x48] sm:$0xff] }
  0x7b   :  { %440 = vmatpush1.msra.mxu1 %v2219_v31  ;;  %1021 = vadd.xlane.f32.xlu1 %v1020_v27  ;;  %v90_v27 = vld [vmem:[%s3563_s1 + $0x38] sm:$0xff] }
  0x7c   :  { %1803 = vmatprep.subr.msk.mxu1 %vm78_vm2, %v2227_v32  ;;  %v378_v33 = vpop.permute.xlu1 %377  ;;  %v370_v34 = vpop.permute.xlu0 %369 }
  0x7d   :  { %442 = vmatpush1.msra.mxu1 %v2234_v35  ;;  %v2239_v36 = vsel %vm383_vm1, %v378_v33, %v370_v34  ;;  %v2243_v37 = vsel %vm383_vm1, %v370_v34, %v378_v33 }
  0x7e   :  { %1804 = vmatprep.subr.msk.mxu1 %vm78_vm2, %v2239_v36  ;;  %v2375_v10 = vsel %vm78_vm2, %v2239_v36, 0.0 }
  0x7f   :  { %444 = vmatpush1.msra.mxu1 %v2243_v37 }
  0x80   :  { %v376_v40 = vpop.permute.xlu1 %375  ;;  %v368_v41 = vpop.permute.xlu0 %367 }
  0x81   :  { %v2261_v42 = vsel %vm383_vm1, %v376_v40, %v368_v41  ;;  %v2265_v43 = vsel %vm383_vm1, %v368_v41, %v376_v40 }
  0x82   :  { %1805 = vmatprep.subr.msk.mxu1 %vm78_vm2, %v2261_v42  ;;  %v2389_v14 = vsel %vm78_vm2, %v2261_v42, 0.0 }
  0x83   :  { %446 = vmatpush1.msra.mxu1 %v2265_v43 }
  0x84   :  { %v349_v45 = vpop.permute.xlu1 %348  ;;  %447 = vmatprep.subr.mxu1 %v2090_v2  ;;  %v341_v46 = vpop.permute.xlu0 %340 }
  0x85   :  { %448 = vmatpush1.msra.mxu1 %v2076_v0  ;;  %v2284_v49 = vsel %vm350_vm3, %v341_v46, %v349_v45  ;;  %v2292_v52 = vsel %vm350_vm3, %v349_v45, %v341_v46 }
  0x86   :  { %449 = vmatprep.subr.mxu1 %v2095_v3  ;;  %1018 = vadd.xlane.f32.xlu0 %v1017_v44  ;;  %v2453_v30 = vsel %vm71_vm4, %v2292_v52, 0.0 }
  0x87   :  { %450 = vmatpush1.msra.mxu1 %v2081_v1 }
  0x88   :  { %v347_v47 = vpop.permute.xlu1 %346  ;;  %451 = vmatprep.subr.mxu1 %v2104_v4  ;;  %v339_v48 = vpop.permute.xlu0 %338 }
  0x89   :  { %452 = vmatpush1.msra.mxu1 %v2109_v5  ;;  %v2299_v53 = vsel %vm350_vm3, %v339_v48, %v347_v47  ;;  %v2304_v54 = vsel %vm350_vm3, %v347_v47, %v339_v48 }
  0x8a   :  { %453 = vmatprep.subr.mxu1 %v2118_v6  ;;  %v363_v36 = vsel %vm71_vm4, %v2304_v54, 0.0 }
  0x8b   :  { %454 = vmatpush1.msra.mxu1 %v2123_v7 }
  0x8c   :  { %618 = vrot.lane.b32.xlu1 %v2219_v31, %s2019_s25  ;;  %v345_v50 = vpop.permute.xlu1 %344  ;;  %455 = vmatprep.subr.mxu1 %v2284_v49  ;;  %v337_v51 = vpop.permute.xlu0 %336 }
  0x8d   :  { %1806 = vmatpush1.msk.msra.mxu1 %vm71_vm4, %v2292_v52  ;;  %v2311_v55 = vsel %vm350_vm3, %v337_v51, %v345_v50  ;;  %v2318_v58 = vsel %vm350_vm3, %v345_v50, %v337_v51  ;;  %v2479_v51 = vld [vmem:[%s3562_s6 + $0x8] sm:$0xff]  ;;  %v2487_v52 = vld [vmem:[%s3562_s6 + $0x10] sm:$0xff] }
  0x8e   :  { %457 = vmatprep.subr.mxu1 %v2299_v53  ;;  %v361_v50 = vsel %vm71_vm4, %v2318_v58, 0.0 }
  0x8f   :  { %1807 = vmatpush1.msk.msra.mxu1 %vm71_vm4, %v2304_v54 }
  0x90   :  { %1204 = vrot.lane.b32.xlu1 %v2202_v25, %s2016_s13  ;;  %v343_v56 = vpop.permute.xlu1 %342  ;;  %459 = vmatprep.subr.mxu1 %v2311_v55  ;;  %v335_v57 = vpop.permute.xlu0 %334 }
  0x91   :  { %1808 = vmatpush1.msk.msra.mxu1 %vm71_vm4, %v2318_v58  ;;  %v2325_v59 = vsel %vm350_vm3, %v335_v57, %v343_v56  ;;  %v2329_v60 = vsel %vm350_vm3, %v343_v56, %v335_v57  ;;  %v2499_v56 = vld [vmem:[%s3562_s6 + $0x18] sm:$0xff] }
  0x92   :  { %461 = vmatprep.subr.mxu1 %v2325_v59  ;;  %v359_v54 = vsel %vm71_vm4, %v2329_v60, 0.0 }
  0x93   :  { %1809 = vmatpush1.msk.msra.mxu1 %vm71_vm4, %v2329_v60 }
  0x94   :  { %1212 = vrot.lane.b32.xlu1 %v2207_v26, %s2016_s13  ;;  %1810 = vmatmul.mubr.msk.f32.vlgmr.msra.gmra.mxu1 %vm400_vm5, %v83_v61 }
  0x95   :  { %501 = vmatprep.mubr.f32.mxu1 %v2018_v18 }
  0x98   :  { %616 = vrot.lane.b32.xlu1 %v2234_v35, %s2019_s25  ;;  %1811 = vmatmul.mubr.msk.f32.gmra.mxu1 %vm400_vm5, %v84_v8 }
  0x99   :  { %507 = vmatprep.mubr.f32.mxu1 %v2018_v18 }
  0x9c   :  { %640 = vrot.lane.b32.xlu1 %v2352_v63, %s2019_s25  ;;  %642 = vrot.lane.b32.xlu0 %v2347_v62, %s2019_s25 }
  0x9d   :  { %1812 = vmatmul.mubr.msk.f32.gmra.mxu1 %vm400_vm5, %v85_v9 }
  0x9e   :  { %513 = vmatprep.mubr.f32.mxu1 %v2018_v18 }
  0xa0   :  { %1210 = vrot.lane.b32.xlu1 %v2257_v39, %s2016_s13  ;;  %1202 = vrot.lane.b32.xlu0 %v2252_v38, %s2016_s13  ;;  %s2020_s13 = smov 127  }
  0xa1   :  { %1813 = vmatmul.mubr.msk.f32.gmra.mxu1 %vm400_vm5, %v86_v13 }
  0xa2   :  { %519 = vmatprep.mubr.f32.mxu1 %v2018_v18 }
  0xa4   :  { %638 = vrot.lane.b32.xlu1 %v2375_v10, %s2019_s25  ;;  %614 = vrot.lane.b32.xlu0 %v2243_v37, %s2019_s25 }
  0xa5   :  { %1814 = vmatmul.mubr.msk.f32.gmra.mxu1 %vm400_vm5, %v87_v17 }
  0xa6   :  { %525 = vmatprep.mubr.f32.mxu1 %v2018_v18 }
  0xa8   :  { %636 = vrot.lane.b32.xlu1 %v2389_v14, %s2019_s25  ;;  %612 = vrot.lane.b32.xlu0 %v2265_v43, %s2019_s25 }
  0xa9   :  { %1815 = vmatmul.mubr.msk.f32.gmra.mxu1 %vm400_vm5, %v88_v23 }
  0xaa   :  { %531 = vmatprep.mubr.f32.mxu1 %v2018_v18 }
  0xac   :  { %634 = vrot.lane.b32.xlu1 %v2090_v2, %s2019_s25  ;;  %610 = vrot.lane.b32.xlu0 %v2076_v0, %s2019_s25 }
  0xad   :  { %1816 = vmatmul.mubr.msk.f32.gmra.mxu1 %vm400_vm5, %v89_v24 }
  0xae   :  { %537 = vmatprep.mubr.f32.mxu1 %v2018_v18 }
  0xb0   :  { %632 = vrot.lane.b32.xlu1 %v2095_v3, %s2019_s25  ;;  %608 = vrot.lane.b32.xlu0 %v2081_v1, %s2019_s25 }
  0xb1   :  { %1817 = vmatmul.mubr.msk.f32.gmra.mxu1 %vm400_vm5, %v90_v27 }
  0xb2   :  { %543 = vmatprep.mubr.f32.mxu1 %v2018_v18 }
  0xb4   :  { %630 = vrot.lane.b32.xlu1 %v2104_v4, %s2019_s25  ;;  %606 = vrot.lane.b32.xlu0 %v2109_v5, %s2019_s25 }
  0xb5   :  { %1818 = vmatmul.mubr.msk.f32.gmra.mxu1 %vm400_vm5, %v91_v28 }
  0xb6   :  { %549 = vmatprep.mubr.f32.mxu1 %v2018_v18 }
  0xb8   :  { %1184 = vrot.lane.b32.xlu1 %v2159_v12, %s2017_s26  ;;  %1176 = vrot.lane.b32.xlu0 %v2154_v11, %s2017_s26 }
  0xb9   :  { %1819 = vmatmul.mubr.msk.f32.gmra.mxu1 %vm400_vm5, %v92_v29 }
  0xba   :  { %1917 = vmatprep.mubr.msk.f32.mxu1 %vm184_vm0, %v2189_v19 }
  0xbc   :  { %628 = vrot.lane.b32.xlu1 %v2118_v6, %s2019_s25  ;;  %604 = vrot.lane.b32.xlu0 %v2123_v7, %s2019_s25 }
  0xc0   :  { %1182 = vrot.lane.b32.xlu1 %v2173_v16, %s2017_s26  ;;  %1174 = vrot.lane.b32.xlu0 %v2168_v15, %s2017_s26 }
  0xc4   :  { %626 = vrot.lane.b32.xlu1 %v2284_v49, %s2019_s25  ;;  %602 = vrot.lane.b32.xlu0 %v2453_v30, %s2019_s25 }
  0xc6   :  { %v178_v32 = vpop.xlane.xlu0 %177 }
  0xc7   :  { %v183_v33 = vmul.f32 0.00390625, %v178_v32 }
  0xc8   :  { %1180 = vrot.lane.b32.xlu1 %v2207_v26, %s2017_s26  ;;  %1172 = vrot.lane.b32.xlu0 %v2202_v25, %s2017_s26 }
  0xc9   :  { %1895 = vmatprep.subr.mxu0 %v183_v33 }
  0xca   :  { %v172_v19 = vpop.xlane.xlu0 %171  ;;  %1896 = vmatpush3.msra.mxu0 %v183_v33 }
  0xcb   :  { %v175_v34 = vpop.xlane.xlu1 %174  ;;  %v181_v41 = vmul.f32 0.00390625, %v172_v19 }
  0xcc   :  { %v182_v40 = vmul.f32 0.00390625, %v175_v34  ;;  %624 = vrot.lane.b32.xlu1 %v2299_v53, %s2019_s25  ;;  %600 = vrot.lane.b32.xlu0 %v363_v36, %s2019_s25 }
  0xce   :  { %1897 = vmatprep.subr.mxu0 %v182_v40  ;;  %v169_v42 = vpop.xlane.xlu0 %168 }
  0xcf   :  { %v180_v44 = vmul.f32 0.00390625, %v169_v42  ;;  %v1028_v45 = vpop.xlane.xlu1 %1027  ;;  %1898 = vmatpush3.msra.mxu0 %v182_v40 }
  0xd0   :  { %v1032_v46 = vmul.f32 0.00390625, %v1028_v45  ;;  %1178 = vrot.lane.b32.xlu1 %v2257_v39, %s2017_s26  ;;  %1170 = vrot.lane.b32.xlu0 %v2252_v38, %s2017_s26 }
  0xd1   :  { %1899 = vmatprep.subr.mxu0 %v181_v41 }
  0xd2   :  { %1900 = vmatpush3.msra.mxu0 %v181_v41  ;;  %1909 = vmatprep.subr.mxu1 %v1032_v46  ;;  %v1025_v47 = vpop.xlane.xlu0 %1024 }
  0xd3   :  { %v1031_v48 = vmul.f32 0.00390625, %v1025_v47  ;;  %1910 = vmatpush3.msra.mxu1 %v1032_v46  ;;  %1901 = vmatprep.subr.mxu0 %v180_v44 }
  0xd4   :  { %622 = vrot.lane.b32.xlu1 %v2311_v55, %s2019_s25  ;;  %598 = vrot.lane.b32.xlu0 %v361_v50, %s2019_s25 }
  0xd5   :  { %1902 = vmatpush3.msra.mxu0 %v180_v44  ;;  %1911 = vmatprep.subr.mxu1 %v1031_v48 }
  0xd6   :  { %1912 = vmatpush3.msra.mxu1 %v1031_v48  ;;  %1904 = vmatmul.mubr.msk.f32.vlgmr.msra.gmra.mxu0 %vm184_vm0, %v2479_v51 }
  0xd7   :  { %1906 = vmatprep.mubr.msk.f32.mxu0 %vm184_vm0, %v2487_v52 }
  0xd8   :  { %620 = vrot.lane.b32.xlu1 %v2325_v59, %s2019_s25  ;;  %596 = vrot.lane.b32.xlu0 %v359_v54, %s2019_s25 }
  0xda   :  { %1907 = vmatmul.mubr.msk.f32.gmra.mxu0 %vm184_vm0, %v2499_v56 }
  0xdb   :  { %745 = vmatprep.mubr.f32.mxu0 %v2018_v18 }
  0xdc   :  { %832 = vrot.lane.b32.xlu1 %v2347_v62, %s2020_s13  ;;  %808 = vrot.lane.b32.xlu0 %v2219_v31, %s2020_s13  ;;  %v2021_v31 = vmov 0  }
  0xdd   :  { %1954 = vset.pattern.permute.xlu0 %v2021_v31  ;;  %1955 = vset.pattern.permute.xlu1 %v2021_v31 }
  0xe0   :  { %830 = vrot.lane.b32.xlu1 %v2352_v63, %s2020_s13  ;;  %806 = vrot.lane.b32.xlu0 %v2234_v35, %s2020_s13 }
  0xe4   :  { %828 = vrot.lane.b32.xlu1 %v2375_v10, %s2020_s13  ;;  %804 = vrot.lane.b32.xlu0 %v2243_v37, %s2020_s13 }
  0xe8   :  { %826 = vrot.lane.b32.xlu1 %v2389_v14, %s2020_s13  ;;  %802 = vrot.lane.b32.xlu0 %v2265_v43, %s2020_s13 }
  0xec   :  { %824 = vrot.lane.b32.xlu1 %v2090_v2, %s2020_s13  ;;  %800 = vrot.lane.b32.xlu0 %v2076_v0, %s2020_s13  ;;  %v1217_v0 = vpop.permute.xlu0 %1216 }
  0xf0   :  { %822 = vrot.lane.b32.xlu1 %v2095_v3, %s2020_s13  ;;  %798 = vrot.lane.b32.xlu0 %v2081_v1, %s2020_s13  ;;  %v1209_v1 = vpop.permute.xlu1 %1208  ;;  %v1207_v2 = vpop.permute.xlu0 %1206 }
  0xf1   :  { %v2563_v37 = vsel %vm383_vm1, %v1209_v1, %v1217_v0 }
  0xf4   :  { %820 = vrot.lane.b32.xlu1 %v2104_v4, %s2020_s13  ;;  %796 = vrot.lane.b32.xlu0 %v2109_v5, %s2020_s13 }
  0xf8   :  { %818 = vrot.lane.b32.xlu1 %v2118_v6, %s2020_s13  ;;  %794 = vrot.lane.b32.xlu0 %v2123_v7, %s2020_s13  ;;  %v2554_v6 = vsel %vm383_vm1, %v1217_v0, %v1209_v1  ;;  %v1215_v7 = vpop.permute.xlu0 %1214 }
  0xf9   :  { %v2559_v35 = vsel %vm78_vm2, %v2554_v6, 0.0  ;;  %v2580_v57 = vsel %vm383_vm1, %v1207_v2, %v1215_v7 }
  0xfc   :  { %816 = vrot.lane.b32.xlu1 %v2284_v49, %s2020_s13  ;;  %792 = vrot.lane.b32.xlu0 %v2453_v30, %s2020_s13  ;;  %v2571_v49 = vsel %vm383_vm1, %v1215_v7, %v1207_v2 }
 0x100   :  { %814 = vrot.lane.b32.xlu1 %v2299_v53, %s2020_s13  ;;  %790 = vrot.lane.b32.xlu0 %v363_v36, %s2020_s13 }
 0x104   :  { %v1022_v3 = vpop.xlane.xlu1 %1021  ;;  %812 = vrot.lane.b32.xlu1 %v2311_v55, %s2020_s13  ;;  %788 = vrot.lane.b32.xlu0 %v361_v50, %s2020_s13  ;;  %v2576_v55 = vsel %vm78_vm2, %v2571_v49, 0.0 }
 0x105   :  { %v1030_v4 = vmul.f32 0.00390625, %v1022_v3 }
 0x107   :  { %1913 = vmatprep.subr.mxu1 %v1030_v4 }
 0x108   :  { %v619_v5 = vpop.permute.xlu1 %618  ;;  %810 = vrot.lane.b32.xlu1 %v2325_v59, %s2020_s13  ;;  %786 = vrot.lane.b32.xlu0 %v359_v54, %s2020_s13 }
 0x109   :  { %1914 = vmatpush3.msra.mxu1 %v1030_v4 }
 0x10c   :  { %v1205_v43 = vpop.permute.xlu1 %1204  ;;  %1441 = vrot.lane.b32.xlu1 %v2559_v35, %s2019_s25  ;;  %1417 = vrot.lane.b32.xlu0 %v2563_v37, %s2019_s25 }
 0x10f   :  { %v1019_v53 = vpop.xlane.xlu0 %1018 }
 0x110   :  { %v1029_v58 = vmul.f32 0.00390625, %v1019_v53  ;;  %v1213_v59 = vpop.permute.xlu1 %1212  ;;  %1439 = vrot.lane.b32.xlu1 %v2576_v55, %s2019_s25  ;;  %1415 = vrot.lane.b32.xlu0 %v2580_v57, %s2019_s25 }
 0x111   :  { %v2589_v60 = vsel %vm383_vm1, %v1213_v59, %v1205_v43  ;;  %v2598_v63 = vsel %vm383_vm1, %v1205_v43, %v1213_v59 }
 0x112   :  { %v2594_v61 = vsel %vm78_vm2, %v2589_v60, 0.0  ;;  %1915 = vmatprep.subr.mxu1 %v1029_v58 }
 0x113   :  { %v643_v62 = vpop.permute.xlu0 %642  ;;  %1916 = vmatpush3.msra.mxu1 %v1029_v58 }
 0x114   :  { %v617_v8 = vpop.permute.xlu1 %616  ;;  %1437 = vrot.lane.b32.xlu1 %v2594_v61, %s2019_s25  ;;  %1413 = vrot.lane.b32.xlu0 %v2598_v63, %s2019_s25  ;;  %v656_v9 = vsel %vm644_vm6, %v619_v5, %v643_v62  ;;  %v668_v10 = vsel %vm644_vm6, %v643_v62, %v619_v5 }
 0x115   :  { %689 = vmatprep.subr.mxu0 %v656_v9  ;;  %1918 = vmatmul.mubr.msk.f32.vlgmr.msra.gmra.mxu1 %vm184_vm0, %v2479_v51 }
 0x116   :  { %690 = vmatpush1.msra.mxu0 %v668_v10  ;;  %1920 = vmatprep.mubr.msk.f32.mxu1 %vm184_vm0, %v2487_v52 }
 0x117   :  { %v1203_v13 = vpop.permute.xlu0 %1202 }
 0x118   :  { %v641_v14 = vpop.permute.xlu1 %640 }
 0x119   :  { %v655_v17 = vsel %vm644_vm6, %v617_v8, %v641_v14  ;;  %v667_v23 = vsel %vm644_vm6, %v641_v14, %v617_v8  ;;  %1921 = vmatmul.mubr.msk.f32.gmra.mxu1 %vm184_vm0, %v2499_v56 }
 0x11a   :  { %691 = vmatprep.subr.mxu0 %v655_v17  ;;  %1531 = vmatprep.mubr.f32.mxu1 %v2018_v18 }
 0x11b   :  { %692 = vmatpush1.msra.mxu0 %v667_v23  ;;  %v615_v24 = vpop.permute.xlu0 %614 }
 0x11c   :  { %v1211_v27 = vpop.permute.xlu1 %1210 }
 0x11d   :  { %v2621_v28 = vsel %vm383_vm1, %v1203_v13, %v1211_v27  ;;  %v2625_v29 = vsel %vm383_vm1, %v1211_v27, %v1203_v13 }
 0x11e   :  { %1411 = vrot.lane.b32.xlu0 %v2621_v28, %s2019_s25  ;;  %v2632_v30 = vsel %vm78_vm2, %v2625_v29, 0.0 }
 0x11f   :  { %1435 = vrot.lane.b32.xlu1 %v2632_v30, %s2019_s25  ;;  %v613_v32 = vpop.permute.xlu0 %612 }
 0x120   :  { %v639_v33 = vpop.permute.xlu1 %638 }
 0x121   :  { %v654_v19 = vsel %vm644_vm6, %v615_v24, %v639_v33  ;;  %v666_v34 = vsel %vm644_vm6, %v639_v33, %v615_v24 }
 0x122   :  { %693 = vmatprep.subr.mxu0 %v654_v19  ;;  %1409 = vrot.lane.b32.xlu0 %v2154_v11, %s2019_s25 }
 0x123   :  { %694 = vmatpush1.msra.mxu0 %v666_v34  ;;  %v611_v36 = vpop.permute.xlu0 %610  ;;  %1433 = vrot.lane.b32.xlu1 %v2159_v12, %s2019_s25 }
 0x124   :  { %v637_v40 = vpop.permute.xlu1 %636 }
 0x125   :  { %v653_v41 = vsel %vm644_vm6, %v613_v32, %v637_v40  ;;  %v665_v42 = vsel %vm644_vm6, %v637_v40, %v613_v32 }
 0x126   :  { %695 = vmatprep.subr.mxu0 %v653_v41  ;;  %1407 = vrot.lane.b32.xlu0 %v2168_v15, %s2019_s25 }
 0x127   :  { %696 = vmatpush1.msra.mxu0 %v665_v42  ;;  %v609_v44 = vpop.permute.xlu0 %608  ;;  %1431 = vrot.lane.b32.xlu1 %v2173_v16, %s2019_s25 }
 0x128   :  { %v635_v45 = vpop.permute.xlu1 %634 }
 0x129   :  { %v652_v46 = vsel %vm644_vm6, %v611_v36, %v635_v45  ;;  %v664_v47 = vsel %vm644_vm6, %v635_v45, %v611_v36 }
 0x12a   :  { %697 = vmatprep.subr.mxu0 %v652_v46  ;;  %1405 = vrot.lane.b32.xlu0 %v2202_v25, %s2019_s25 }
 0x12b   :  { %698 = vmatpush1.msra.mxu0 %v664_v47  ;;  %v607_v48 = vpop.permute.xlu0 %606  ;;  %1429 = vrot.lane.b32.xlu1 %v2207_v26, %s2019_s25 }
 0x12c   :  { %v633_v50 = vpop.permute.xlu1 %632 }
 0x12d   :  { %v651_v51 = vsel %vm644_vm6, %v609_v44, %v633_v50  ;;  %v663_v52 = vsel %vm644_vm6, %v633_v50, %v609_v44 }
 0x12e   :  { %699 = vmatprep.subr.mxu0 %v651_v51  ;;  %1403 = vrot.lane.b32.xlu0 %v2252_v38, %s2019_s25 }
 0x12f   :  { %700 = vmatpush1.msra.mxu0 %v663_v52  ;;  %v1177_v54 = vpop.permute.xlu0 %1176  ;;  %1427 = vrot.lane.b32.xlu1 %v2257_v39, %s2019_s25 }
 0x130   :  { %v631_v56 = vpop.permute.xlu1 %630 }
 0x131   :  { %v650_v0 = vsel %vm644_vm6, %v607_v48, %v631_v56  ;;  %v662_v1 = vsel %vm644_vm6, %v631_v56, %v607_v48 }
 0x132   :  { %701 = vmatprep.subr.mxu0 %v650_v0 }
 0x133   :  { %702 = vmatpush1.msra.mxu0 %v662_v1  ;;  %v605_v2 = vpop.permute.xlu0 %604 }
 0x134   :  { %v1185_v3 = vpop.permute.xlu1 %1184 }
 0x135   :  { %v2674_v4 = vsel %vm350_vm3, %v1185_v3, %v1177_v54  ;;  %v2678_v5 = vsel %vm350_vm3, %v1177_v54, %v1185_v3 }
 0x136   :  { %1425 = vrot.lane.b32.xlu1 %v2678_v5, %s2019_s25  ;;  %v2685_v7 = vsel %vm71_vm4, %v2674_v4, 0.0 }
 0x137   :  { %1401 = vrot.lane.b32.xlu0 %v2685_v7, %s2019_s25  ;;  %v1175_v31 = vpop.permute.xlu0 %1174 }
 0x138   :  { %v629_v43 = vpop.permute.xlu1 %628 }
 0x139   :  { %v649_v53 = vsel %vm644_vm6, %v605_v2, %v629_v43  ;;  %v661_v58 = vsel %vm644_vm6, %v629_v43, %v605_v2  ;;  %v2767_v2 = vld [vmem:[%s3564_s2] sm:$0xff] }
 0x13a   :  { %703 = vmatprep.subr.mxu0 %v649_v53 }
 0x13b   :  { %704 = vmatpush1.msra.mxu0 %v661_v58  ;;  %v603_v59 = vpop.permute.xlu0 %602 }
 0x13c   :  { %v1183_v62 = vpop.permute.xlu1 %1182 }
 0x13d   :  { %v2695_v8 = vsel %vm350_vm3, %v1183_v62, %v1175_v31  ;;  %v2699_v9 = vsel %vm350_vm3, %v1175_v31, %v1183_v62 }
 0x13e   :  { %1423 = vrot.lane.b32.xlu1 %v2699_v9, %s2019_s25  ;;  %v2706_v10 = vsel %vm71_vm4, %v2695_v8, 0.0 }
 0x13f   :  { %1399 = vrot.lane.b32.xlu0 %v2706_v10, %s2019_s25  ;;  %v1173_v13 = vpop.permute.xlu0 %1172 }
 0x140   :  { %v627_v14 = vpop.permute.xlu1 %626 }
 0x141   :  { %v648_v17 = vsel %vm644_vm6, %v603_v59, %v627_v14  ;;  %v660_v23 = vsel %vm644_vm6, %v627_v14, %v603_v59  ;;  %v2804_v14 = vld [vmem:[%s3564_s2 + $0x10] sm:$0xff] }
 0x142   :  { %705 = vmatprep.subr.mxu0 %v648_v17 }
 0x143   :  { %706 = vmatpush1.msra.mxu0 %v660_v23  ;;  %v601_v24 = vpop.permute.xlu0 %600 }
 0x144   :  { %v1181_v27 = vpop.permute.xlu1 %1180 }
 0x145   :  { %v2716_v32 = vsel %vm350_vm3, %v1173_v13, %v1181_v27  ;;  %v2720_v33 = vsel %vm350_vm3, %v1181_v27, %v1173_v13 }
 0x146   :  { %v2725_v19 = vsel %vm71_vm4, %v2720_v33, 0.0  ;;  %1421 = vrot.lane.b32.xlu1 %v2716_v32, %s2019_s25 }
 0x147   :  { %1397 = vrot.lane.b32.xlu0 %v2725_v19, %s2019_s25  ;;  %v1171_v34 = vpop.permute.xlu0 %1170 }
 0x148   :  { %v625_v36 = vpop.permute.xlu1 %624 }
 0x149   :  { %v659_v40 = vsel %vm644_vm6, %v625_v36, %v601_v24  ;;  %v647_v41 = vsel %vm644_vm6, %v601_v24, %v625_v36  ;;  %v2824_v36 = vld [vmem:[%s3564_s2 + $0x18] sm:$0xff] }
 0x14a   :  { %707 = vmatprep.subr.mxu0 %v647_v41 }
 0x14b   :  { %708 = vmatpush1.msra.mxu0 %v659_v40  ;;  %v599_v42 = vpop.permute.xlu0 %598 }
 0x14c   :  { %v1179_v44 = vpop.permute.xlu1 %1178 }
 0x14d   :  { %v2737_v45 = vsel %vm350_vm3, %v1171_v34, %v1179_v44  ;;  %v2741_v46 = vsel %vm350_vm3, %v1179_v44, %v1171_v34 }
 0x14e   :  { %v2746_v47 = vsel %vm71_vm4, %v2741_v46, 0.0  ;;  %1419 = vrot.lane.b32.xlu1 %v2737_v45, %s2019_s25 }
 0x14f   :  { %1395 = vrot.lane.b32.xlu0 %v2746_v47, %s2019_s25  ;;  %v597_v48 = vpop.permute.xlu0 %596 }
 0x150   :  { %v623_v50 = vpop.permute.xlu1 %622 }
 0x151   :  { %v658_v51 = vsel %vm644_vm6, %v623_v50, %v599_v42  ;;  %v646_v52 = vsel %vm644_vm6, %v599_v42, %v623_v50 }
 0x152   :  { %1618 = vrot.lane.b32.xlu1 %v2559_v35, %s2020_s13  ;;  %709 = vmatprep.subr.mxu0 %v646_v52 }
 0x153   :  { %1594 = vrot.lane.b32.xlu0 %v2563_v37, %s2020_s13  ;;  %710 = vmatpush1.msra.mxu0 %v658_v51  ;;  %v809_v54 = vpop.permute.xlu0 %808 }
 0x154   :  { %v621_v56 = vpop.permute.xlu1 %620  ;;  %v2788_v53 = vpop.f32.mrf.mxu1 }
 0x155   :  { %v657_v0 = vsel %vm644_vm6, %v621_v56, %v597_v48  ;;  %v645_v1 = vsel %vm644_vm6, %v597_v48, %v621_v56 }
 0x156   :  { %1616 = vrot.lane.b32.xlu1 %v2576_v55, %s2020_s13  ;;  %711 = vmatprep.subr.mxu0 %v645_v1  ;;  %v2784_v55 = vld [vmem:[%s3564_s2 + $0x8] sm:$0xff]  ;;  %v2794_v62 = vpop.f32.mrf.mxu1 }
 0x157   :  { %1592 = vrot.lane.b32.xlu0 %v2580_v57, %s2020_s13  ;;  %712 = vmatpush1.msra.mxu0 %v657_v0  ;;  %v807_v35 = vpop.permute.xlu0 %806 }
 0x158   :  { %v833_v3 = vpop.permute.xlu1 %832  ;;  %1820 = vmatmul.mubr.msk.f32.vlgmr.msra.gmra.mxu0 %vm400_vm5, %v2767_v2  ;;  %v2808_v17 = vpop.f32.mrf.mxu1 }
 0x159   :  { %v846_v31 = vsel %vm834_vm7, %v809_v54, %v833_v3  ;;  %v858_v43 = vsel %vm834_vm7, %v833_v3, %v809_v54  ;;  %751 = vmatprep.mubr.f32.mxu0 %v2018_v18 }
 0x15a   :  { %1614 = vrot.lane.b32.xlu1 %v2594_v61, %s2020_s13  ;;  %879 = vmatprep.subr.mxu0 %v858_v43  ;;  %v2814_v27 = vpop.f32.mrf.mxu1 }
 0x15b   :  { %1590 = vrot.lane.b32.xlu0 %v2598_v63, %s2020_s13  ;;  %880 = vmatpush1.msra.mxu0 %v846_v31  ;;  %v805_v58 = vpop.permute.xlu0 %804 }
 0x15c   :  { %v831_v59 = vpop.permute.xlu1 %830  ;;  %1821 = vmatmul.mubr.msk.f32.gmra.mxu0 %vm400_vm5, %v2784_v55 }
 0x15d   :  { %v845_v13 = vsel %vm834_vm7, %v807_v35, %v831_v59  ;;  %v857_v61 = vsel %vm834_vm7, %v831_v59, %v807_v35  ;;  %757 = vmatprep.mubr.f32.mxu0 %v2018_v18  ;;  %v2828_v40 = vpop.f32.mrf.mxu1 }
 0x15e   :  { %1612 = vrot.lane.b32.xlu1 %v2632_v30, %s2020_s13  ;;  %881 = vmatprep.subr.mxu0 %v857_v61 }
 0x15f   :  { %1588 = vrot.lane.b32.xlu0 %v2621_v28, %s2020_s13  ;;  %882 = vmatpush1.msra.mxu0 %v845_v13  ;;  %v803_v23 = vpop.permute.xlu0 %802  ;;  %v2834_v44 = vpop.f32.mrf.mxu1 }
 0x160   :  { %v829_v24 = vpop.permute.xlu1 %828  ;;  %1822 = vmatmul.mubr.msk.f32.gmra.mxu0 %vm400_vm5, %v2804_v14 }
 0x161   :  { %v844_v34 = vsel %vm834_vm7, %v805_v58, %v829_v24  ;;  %v856_v30 = vsel %vm834_vm7, %v829_v24, %v805_v58  ;;  %763 = vmatprep.mubr.f32.mxu0 %v2018_v18 }
 0x162   :  { %1610 = vrot.lane.b32.xlu1 %v2159_v12, %s2020_s13  ;;  %883 = vmatprep.subr.mxu0 %v856_v30 }
 0x163   :  { %1586 = vrot.lane.b32.xlu0 %v2154_v11, %s2020_s13  ;;  %884 = vmatpush1.msra.mxu0 %v844_v34  ;;  %v801_v41 = vpop.permute.xlu0 %800  ;;  %v2843_v11 = vpop.f32.mrf.mxu1 }
 0x164   :  { %v827_v42 = vpop.permute.xlu1 %826  ;;  %1823 = vmatmul.mubr.msk.f32.gmra.mxu0 %vm400_vm5, %v2824_v36 }
 0x165   :  { %v843_v48 = vsel %vm834_vm7, %v803_v23, %v827_v42  ;;  %v855_v12 = vsel %vm834_vm7, %v827_v42, %v803_v23  ;;  %935 = vmatprep.mubr.f32.mxu0 %v2018_v18  ;;  %v2847_v52 = vpop.f32.mrf.mxu1 }
 0x166   :  { %1608 = vrot.lane.b32.xlu1 %v2173_v16, %s2020_s13  ;;  %885 = vmatprep.subr.mxu0 %v855_v12 }
 0x167   :  { %1584 = vrot.lane.b32.xlu0 %v2168_v15, %s2020_s13  ;;  %886 = vmatpush1.msra.mxu0 %v843_v48  ;;  %v799_v50 = vpop.permute.xlu0 %798  ;;  %v2855_v16 = vpop.f32.mrf.mxu1 }
 0x168   :  { %v825_v51 = vpop.permute.xlu1 %824 }
 0x169   :  { %v842_v54 = vsel %vm834_vm7, %v801_v41, %v825_v51  ;;  %v854_v56 = vsel %vm834_vm7, %v825_v51, %v801_v41  ;;  %v2859_v1 = vpop.f32.mrf.mxu1 }
 0x16a   :  { %1606 = vrot.lane.b32.xlu1 %v2207_v26, %s2020_s13  ;;  %887 = vmatprep.subr.mxu0 %v854_v56 }
 0x16b   :  { %1582 = vrot.lane.b32.xlu0 %v2202_v25, %s2020_s13  ;;  %v797_v15 = vpop.permute.xlu0 %796  ;;  %888 = vmatpush1.msra.mxu0 %v842_v54  ;;  %v2867_v26 = vpop.f32.mrf.mxu1  ;;  %v580_v54 = vshrl.u32 %v32_v20, 7 }
 0x16c   :  { %v823_v0 = vpop.permute.xlu1 %822 }
 0x16d   :  { %v841_v35 = vsel %vm834_vm7, %v799_v50, %v823_v0  ;;  %v853_v3 = vsel %vm834_vm7, %v823_v0, %v799_v50  ;;  %v2871_v43 = vpop.f32.mrf.mxu1  ;;  %v2022_v50 = vmov 1966171168  }
 0x16e   :  { %1604 = vrot.lane.b32.xlu1 %v2257_v39, %s2020_s13  ;;  %889 = vmatprep.subr.mxu0 %v853_v3  ;;  %v577_v51 = vunpack.c.l.s4 %v2022_v50 }
 0x16f   :  { %1580 = vrot.lane.b32.xlu0 %v2252_v38, %s2020_s13  ;;  %v795_v25 = vpop.permute.xlu0 %794  ;;  %890 = vmatpush1.msra.mxu0 %v841_v35  ;;  %v2879_v39 = vpop.f32.mrf.mxu1 }
 0x170   :  { %v821_v31 = vpop.permute.xlu1 %820  ;;  %v578_v3 = vunpack.c.0.s8 %v577_v51  ;;  %v105_v51 = vld [vmem:[%s3566_s4 + $0x10] sm:$0xff] }
 0x171   :  { %v840_v58 = vsel %vm834_vm7, %v797_v15, %v821_v31  ;;  %v852_v59 = vsel %vm834_vm7, %v821_v31, %v797_v15  ;;  %v2883_v61 = vpop.f32.mrf.mxu1 }
 0x172   :  { %1602 = vrot.lane.b32.xlu1 %v2678_v5, %s2020_s13  ;;  %891 = vmatprep.subr.mxu0 %v852_v59 }
 0x173   :  { %1578 = vrot.lane.b32.xlu0 %v2685_v7, %s2020_s13  ;;  %v793_v38 = vpop.permute.xlu0 %792  ;;  %892 = vmatpush1.msra.mxu0 %v840_v58  ;;  %v2891_v34 = vpop.f32.mrf.mxu1 }
 0x174   :  { %v819_v13 = vpop.permute.xlu1 %818 }
 0x175   :  { %v839_v23 = vsel %vm834_vm7, %v795_v25, %v819_v13  ;;  %v851_v24 = vsel %vm834_vm7, %v819_v13, %v795_v25  ;;  %v2895_v41 = vpop.f32.mrf.mxu1  ;;  %v104_v13 = vld [vmem:[%s3566_s4 + $0x8] sm:$0xff] }
 0x176   :  { %1600 = vrot.lane.b32.xlu1 %v2699_v9, %s2020_s13  ;;  %893 = vmatprep.subr.mxu0 %v851_v24 }
 0x177   :  { %1576 = vrot.lane.b32.xlu0 %v2706_v10, %s2020_s13  ;;  %v791_v7 = vpop.permute.xlu0 %790  ;;  %894 = vmatpush1.msra.mxu0 %v839_v23  ;;  %v545_v12 = vpop.f32.mrf.mxu1  ;;  %v2906_v10 = vstv %s3565_s3 }
 0x178   :  { %v817_v30 = vpop.permute.xlu1 %816  ;;  %v571_v15 = vadd.f32 %v2906_v10, %v545_v12 }
 0x179   :  { %v838_v42 = vsel %vm834_vm7, %v793_v38, %v817_v30  ;;  %v850_v48 = vsel %vm834_vm7, %v817_v30, %v793_v38  ;;  %v547_v35 = vpop.f32.mrf.mxu1 }
 0x17a   :  { %1598 = vrot.lane.b32.xlu1 %v2716_v32, %s2020_s13  ;;  %895 = vmatprep.subr.mxu0 %v850_v48  ;;  %v572_v58 = vadd.f32 %v2906_v10, %v547_v35  ;;  %v2953_v35 = vld [vmem:[%s3564_s2 + $0x20] sm:$0xff] }
 0x17b   :  { %1574 = vrot.lane.b32.xlu0 %v2725_v19, %s2020_s13  ;;  %896 = vmatpush1.msra.mxu0 %v838_v42  ;;  %v789_v56 = vpop.permute.xlu0 %788  ;;  %v2919_v19 = vsub.s32 %v578_v3, %v580_v54  ;;  %v551_v59 = vpop.f32.mrf.mxu1 }
 0x17c   :  { %v815_v0 = vpop.permute.xlu1 %814  ;;  %v575_v23 = vcombine.low %v571_v15, %v572_v58  ;;  %v2974_v59 = vld [vmem:[%s3564_s2 + $0x28] sm:$0xff] }
 0x17d   :  { %v837_v25 = vsel %vm834_vm7, %v791_v7, %v815_v0  ;;  %v849_v31 = vsel %vm834_vm7, %v815_v0, %v791_v7  ;;  %v103_v7 = vld [vmem:[%s3566_s4] sm:$0xff]  ;;  %v552_v30 = vpop.f32.mrf.mxu1 }
 0x17e   :  { %1596 = vrot.lane.b32.xlu1 %v2737_v45, %s2020_s13  ;;  %897 = vmatprep.subr.mxu0 %v849_v31  ;;  %v3027_v30 = vld [vmem:[%s3561_s0 + $0x60] sm:$0xff] }
 0x17f   :  { %1572 = vrot.lane.b32.xlu0 %v2746_v47, %s2020_s13  ;;  %898 = vmatpush1.msra.mxu0 %v837_v25  ;;  %v787_v38 = vpop.permute.xlu0 %786  ;;  %v582_v47 = vrot.slane %v575_v23, %v2919_v19 }
 0x180   :  { %v813_v24 = vpop.permute.xlu1 %812 }
 0x181   :  { %v836_v42 = vsel %vm834_vm7, %v789_v56, %v813_v24  ;;  %v848_v48 = vsel %vm834_vm7, %v813_v24, %v789_v56  ;;  %v589_v54 = vrot.slane %v582_v47, %v2919_v19  ;;  %v106_v56 = vld [vmem:[%s3566_s4 + $0x18] sm:$0xff] }
 0x182   :  { %899 = vmatprep.subr.mxu0 %v848_v48  ;;  %114 = vperm.xlu1 %1955, %v104_v13   ;;  %v3016_v24 = vld [vmem:[%s3564_s2 + $0x38] sm:$0xff] }
 0x183   :  { %900 = vmatpush1.msra.mxu0 %v836_v42  ;;  %v1418_v50 = vpop.permute.xlu0 %1417  ;;  %109 = vperm.xlu0 %1954, %v103_v7   ;;  %595 = vst.msk [vmem:[%s3567_s9] sm:$0x3] %vm2935_vm8, %v589_v54  ;;  %v3021_v7 = vld [vmem:[%s3561_s0 + $0x68] sm:$0xff]  ;;  %v3035_v48 = vld [vmem:[%s3561_s0 + $0x58] sm:$0xff]  ;;  %v3048_v54 = vld [vmem:[%s3561_s0 + $0x50] sm:$0xff] }
 0x184   :  { %v811_v15 = vpop.permute.xlu1 %810 }
 0x185   :  { %v835_v20 = vsel %vm834_vm7, %v787_v38, %v811_v15  ;;  %v847_v0 = vsel %vm834_vm7, %v811_v15, %v787_v38 }
 0x186   :  { %901 = vmatprep.subr.mxu0 %v847_v0  ;;  %119 = vperm.xlu1 %1955, %v105_v51  }
 0x187   :  { %902 = vmatpush1.msra.mxu0 %v835_v20  ;;  %v1416_v3 = vpop.permute.xlu0 %1415  ;;  %124 = vperm.xlu0 %1954, %v106_v56   ;;  %v127_v56 = vld [vmem:[%s3568_s5] sm:$0xff]  ;;  %v3060_v20 = vld [vmem:[%s3561_s0 + $0x48] sm:$0xff] }
 0x188   :  { %v1442_v25 = vpop.permute.xlu1 %1441  ;;  %1824 = vmatmul.mubr.msk.f32.vlgmr.msra.gmra.mxu0 %vm400_vm5, %v2953_v35  ;;  %1844 = vmatprep.subr.msk.mxu0 %vm78_vm2, %v2554_v6 }
 0x189   :  { %v1466_v31 = vsel %vm644_vm6, %v1442_v25, %v1418_v50  ;;  %1243 = vmatpush1.msra.mxu0 %v2563_v37  ;;  %v1454_v58 = vsel %vm644_vm6, %v1418_v50, %v1442_v25  ;;  %941 = vmatprep.mubr.f32.mxu0 %v2018_v18  ;;  %v3041_v50 = vld [vmem:[%s3569_s7 + $0x8] sm:$0xff]  ;;  %v3069_v25 = vld [vmem:[%s3561_s0 + $0x40] sm:$0xff] }
 0x18a   :  { %1845 = vmatprep.subr.msk.mxu0 %vm78_vm2, %v2571_v49  ;;  %1475 = vmatprep.subr.mxu1 %v1454_v58  ;;  %v3076_v58 = vld [vmem:[%s3569_s7] sm:$0xff] }
 0x18b   :  { %1245 = vmatpush1.msra.mxu0 %v2580_v57  ;;  %1476 = vmatpush1.msra.mxu1 %v1466_v31  ;;  %v1414_v6 = vpop.permute.xlu0 %1413  ;;  %v2994_v57 = vld [vmem:[%s3564_s2 + $0x30] sm:$0xff] }
 0x18c   :  { %v1440_v37 = vpop.permute.xlu1 %1439  ;;  %1825 = vmatmul.mubr.msk.f32.gmra.mxu0 %vm400_vm5, %v2974_v59  ;;  %1846 = vmatprep.subr.msk.mxu0 %vm78_vm2, %v2589_v60 }
 0x18d   :  { %v1465_v38 = vsel %vm644_vm6, %v1440_v37, %v1416_v3  ;;  %1247 = vmatpush1.msra.mxu0 %v2598_v63  ;;  %v1453_v49 = vsel %vm644_vm6, %v1416_v3, %v1440_v37  ;;  %947 = vmatprep.mubr.f32.mxu0 %v2018_v18  ;;  %v1988_v63 = vld [vmem:[%s3561_s0 + $0x78] sm:$0xff]  ;;  %v128_v3 = vld [vmem:[%s3568_s5 + $0x8] sm:$0xff] }
 0x18e   :  { %1847 = vmatprep.subr.msk.mxu0 %vm78_vm2, %v2625_v29  ;;  %1477 = vmatprep.subr.mxu1 %v1453_v49  ;;  %v1989_v29 = vld [vmem:[%s3561_s0 + $0x70] sm:$0xff] }
 0x18f   :  { %1249 = vmatpush1.msra.mxu0 %v2621_v28  ;;  %1478 = vmatpush1.msra.mxu1 %v1465_v38 }
 0x190   :  { %v1438_v60 = vpop.permute.xlu1 %1437  ;;  %1826 = vmatmul.mubr.msk.f32.gmra.mxu0 %vm400_vm5, %v2994_v57  ;;  %1250 = vmatprep.subr.mxu0 %v1988_v63  ;;  %v1412_v13 = vpop.permute.xlu0 %1411 }
 0x191   :  { %v1464_v23 = vsel %vm644_vm6, %v1438_v60, %v1414_v6  ;;  %1251 = vmatpush1.msra.mxu0 %v1989_v29  ;;  %v1452_v28 = vsel %vm644_vm6, %v1414_v6, %v1438_v60  ;;  %953 = vmatprep.mubr.f32.mxu0 %v2018_v18 }
 0x192   :  { %1252 = vmatprep.subr.mxu0 %v3021_v7  ;;  %1479 = vmatprep.subr.mxu1 %v1452_v28  ;;  %v3105_v28 = vld [vmem:[%s3569_s7 + $0x10] sm:$0xff] }
 0x193   :  { %1253 = vmatpush1.msra.mxu0 %v3027_v30  ;;  %1480 = vmatpush1.msra.mxu1 %v1464_v23  ;;  %v130_v23 = vld [vmem:[%s3568_s5 + $0x18] sm:$0xff] }
 0x194   :  { %v1436_v42 = vpop.permute.xlu1 %1435  ;;  %1827 = vmatmul.mubr.msk.f32.gmra.mxu0 %vm400_vm5, %v3016_v24  ;;  %1254 = vmatprep.subr.mxu0 %v3035_v48  ;;  %v1410_v47 = vpop.permute.xlu0 %1409 }
 0x195   :  { %v1463_v51 = vsel %vm644_vm6, %v1436_v42, %v1412_v13  ;;  %1255 = vmatpush1.msra.mxu0 %v3048_v54  ;;  %v1451_v15 = vsel %vm644_vm6, %v1412_v13, %v1436_v42  ;;  %1298 = vmatprep.mubr.f32.mxu0 %v2018_v18  ;;  %v3089_v13 = vld [vmem:[%s3569_s7 + $0x18] sm:$0xff] }
 0x196   :  { %1256 = vmatprep.subr.mxu0 %v3060_v20  ;;  %1481 = vmatprep.subr.mxu1 %v1451_v15  ;;  %v1905_v0 = vpop.f32.mrf.mxu0 }
 0x197   :  { %1257 = vmatpush1.msra.mxu0 %v3069_v25  ;;  %1482 = vmatpush1.msra.mxu1 %v1463_v51  ;;  %v269_v31 = vadd.f32 %v1905_v0, %v3041_v50 }
 0x198   :  { %v1434_v6 = vpop.permute.xlu1 %1433  ;;  %1258 = vmatprep.subr.mxu0 %v2678_v5  ;;  %v1408_v37 = vpop.permute.xlu0 %1407  ;;  %133 = vperm.xlu1 %1955, %v127_v56   ;;  %v129_v5 = vld [vmem:[%s3568_s5 + $0x10] sm:$0xff] }
 0x199   :  { %1848 = vmatpush1.msk.msra.mxu0 %vm71_vm4, %v2674_v4  ;;  %v1462_v38 = vsel %vm644_vm6, %v1434_v6, %v1410_v47  ;;  %v1450_v49 = vsel %vm644_vm6, %v1410_v47, %v1434_v6  ;;  %v1799_v60 = vmul.f32 -1.442695, %v269_v31  ;;  %v263_v63 = vpop.f32.mrf.mxu0  ;;  %138 = vperm.xlu0 %1954, %v128_v3   ;;  %v1996_v31 = vld [vmem:[%s3563_s1] sm:$0xff] }
 0x19a   :  { %1260 = vmatprep.subr.mxu0 %v2699_v9  ;;  %1483 = vmatprep.subr.mxu1 %v1450_v49  ;;  %v264_v4 = vadd.f32 %v263_v63, %v3076_v58 }
 0x19b   :  { %1849 = vmatpush1.msk.msra.mxu0 %vm71_vm4, %v2695_v8  ;;  %1484 = vmatpush1.msra.mxu1 %v1462_v38  ;;  %1956 = vpow2.f32 %v1799_v60  ;;  %v1908_v29 = vpop.f32.mrf.mxu0  ;;  %v1997_v38 = vld [vmem:[%s3563_s1 + $0x8] sm:$0xff] }
 0x19c   :  { %v1432_v9 = vpop.permute.xlu1 %1431  ;;  %1262 = vmatprep.subr.mxu0 %v2716_v32  ;;  %v1798_v42 = vmul.f32 -1.442695, %v264_v4  ;;  %v279_v47 = vadd.f32 %v1908_v29, %v3089_v13  ;;  %143 = vperm.xlu1 %1955, %v129_v5   ;;  %v1406_v51 = vpop.permute.xlu0 %1405  ;;  %v1998_v4 = vld [vmem:[%s3563_s1 + $0x10] sm:$0xff] }
 0x19d   :  { %1850 = vmatpush1.msk.msra.mxu0 %vm71_vm4, %v2720_v33  ;;  %v1461_v8 = vsel %vm644_vm6, %v1432_v9, %v1408_v37  ;;  %v1449_v15 = vsel %vm644_vm6, %v1408_v37, %v1432_v9  ;;  %v273_v56 = vpop.f32.mrf.mxu0  ;;  %148 = vperm.xlu0 %1954, %v130_v23  }
 0x19e   :  { %1264 = vmatprep.subr.mxu0 %v2737_v45  ;;  %1485 = vmatprep.subr.mxu1 %v1449_v15  ;;  %1958 = vpow2.f32 %v1798_v42  ;;  %v1801_v32 = vmul.f32 -1.442695, %v279_v47  ;;  %v274_v0 = vadd.f32 %v273_v56, %v3105_v28 }
 0x19f   :  { %1851 = vmatpush1.msk.msra.mxu0 %vm71_vm4, %v2741_v46  ;;  %1486 = vmatpush1.msra.mxu1 %v1461_v8 }
 0x1a0   :  { %v1430_v33 = vpop.permute.xlu1 %1429  ;;  %1960 = vpow2.f32 %v1801_v32  ;;  %v1800_v3 = vmul.f32 -1.442695, %v274_v0  ;;  %1852 = vmatmul.mubr.msk.f32.vlgmr.msra.gmra.mxu0 %vm400_vm5, %v1996_v31  ;;  %v1404_v46 = vpop.permute.xlu0 %1403 }
 0x1a1   :  { %v1460_v45 = vsel %vm644_vm6, %v1430_v33, %v1406_v51  ;;  %v1448_v6 = vsel %vm644_vm6, %v1406_v51, %v1430_v33  ;;  %1304 = vmatprep.mubr.f32.mxu0 %v2018_v18  ;;  %v1999_v51 = vld [vmem:[%s3563_s1 + $0x18] sm:$0xff] }
 0x1a2   :  { %1487 = vmatprep.subr.mxu1 %v1448_v6  ;;  %1962 = vpow2.f32 %v1800_v3  ;;  %v2000_v3 = vld [vmem:[%s3563_s1 + $0x20] sm:$0xff] }
 0x1a3   :  { %1488 = vmatpush1.msra.mxu1 %v1460_v45 }
 0x1a4   :  { %v1428_v37 = vpop.permute.xlu1 %1427  ;;  %1853 = vmatmul.mubr.msk.f32.gmra.mxu0 %vm400_vm5, %v1997_v38 }
 0x1a5   :  { %v1459_v49 = vsel %vm644_vm6, %v1428_v37, %v1404_v46  ;;  %v1447_v60 = vsel %vm644_vm6, %v1404_v46, %v1428_v37  ;;  %1310 = vmatprep.mubr.f32.mxu0 %v2018_v18  ;;  %v2001_v46 = vld [vmem:[%s3563_s1 + $0x28] sm:$0xff] }
 0x1a6   :  { %1489 = vmatprep.subr.mxu1 %v1447_v60 }
 0x1a7   :  { %1490 = vmatpush1.msra.mxu1 %v1459_v49  ;;  %v2002_v49 = vld [vmem:[%s3563_s1 + $0x30] sm:$0xff] }
 0x1a8   :  { %v1957_v63 = vpop.eup %1956  ;;  %v1426_v5 = vpop.permute.xlu1 %1425  ;;  %1854 = vmatmul.mubr.msk.f32.gmra.mxu0 %vm400_vm5, %v1998_v4 }
 0x1a9   :  { %v1402_v23 = vpop.permute.xlu0 %1401  ;;  %v295_v29 = vadd.f32 1.0, %v1957_v63  ;;  %1316 = vmatprep.mubr.f32.mxu0 %v2018_v18 }
 0x1aa   :  { %v1458_v9 = vsel %vm644_vm6, %v1426_v5, %v1402_v23  ;;  %v1446_v42 = vsel %vm644_vm6, %v1402_v23, %v1426_v5 }
 0x1ab   :  { %v1959_v47 = vpop.eup %1958  ;;  %1964 = vrcp.f32 %v295_v29  ;;  %1491 = vmatprep.subr.mxu1 %v1446_v42  ;;  %v2003_v29 = vld [vmem:[%s3563_s1 + $0x38] sm:$0xff] }
 0x1ac   :  { %1492 = vmatpush1.msra.mxu1 %v1458_v9  ;;  %v294_v8 = vadd.f32 1.0, %v1959_v47  ;;  %1855 = vmatmul.mubr.msk.f32.gmra.mxu0 %vm400_vm5, %v1999_v51 }
 0x1ad   :  { %v1961_v15 = vpop.eup %1960  ;;  %1322 = vmatprep.mubr.f32.mxu0 %v2018_v18 }
 0x1ae   :  { %1966 = vrcp.f32 %v294_v8  ;;  %v297_v56 = vadd.f32 1.0, %v1961_v15  ;;  %v2004_v8 = vld [vmem:[%s3563_s1 + $0x40] sm:$0xff] }
 0x1af   :  { %v1963_v32 = vpop.eup %1962 }
 0x1b0   :  { %v1424_v0 = vpop.permute.xlu1 %1423  ;;  %1968 = vrcp.f32 %v297_v56  ;;  %v296_v33 = vadd.f32 1.0, %v1963_v32  ;;  %1856 = vmatmul.mubr.msk.f32.gmra.mxu0 %vm400_vm5, %v2000_v3 }
 0x1b1   :  { %v1400_v31 = vpop.permute.xlu0 %1399  ;;  %1328 = vmatprep.mubr.f32.mxu0 %v2018_v18 }
 0x1b2   :  { %v1457_v45 = vsel %vm644_vm6, %v1424_v0, %v1400_v31  ;;  %v1445_v6 = vsel %vm644_vm6, %v1400_v31, %v1424_v0  ;;  %1970 = vrcp.f32 %v296_v33  ;;  %v2005_v0 = vld [vmem:[%s3563_s1 + $0x48] sm:$0xff] }
 0x1b3   :  { %1493 = vmatprep.subr.mxu1 %v1445_v6 }
 0x1b4   :  { %1494 = vmatpush1.msra.mxu1 %v1457_v45  ;;  %1857 = vmatmul.mubr.msk.f32.gmra.mxu0 %vm400_vm5, %v2001_v46 }
 0x1b5   :  { %1334 = vmatprep.mubr.f32.mxu0 %v2018_v18 }
 0x1b8   :  { %v1965_v37 = vpop.eup %1964  ;;  %v1422_v38 = vpop.permute.xlu1 %1421  ;;  %1858 = vmatmul.mubr.msk.f32.gmra.mxu0 %vm400_vm5, %v2002_v49 }
 0x1b9   :  { %v1398_v60 = vpop.permute.xlu0 %1397  ;;  %313 = vperm.xlu0 %1954, %v1965_v37   ;;  %1340 = vmatprep.mubr.f32.mxu0 %v2018_v18 }
 0x1ba   :  { %v1456_v63 = vsel %vm644_vm6, %v1422_v38, %v1398_v60  ;;  %v1444_v5 = vsel %vm644_vm6, %v1398_v60, %v1422_v38 }
 0x1bb   :  { %v1967_v4 = vpop.eup %1966  ;;  %1495 = vmatprep.subr.mxu1 %v1444_v5 }
 0x1bc   :  { %1496 = vmatpush1.msra.mxu1 %v1456_v63  ;;  %308 = vperm.xlu1 %1955, %v1967_v4  }
 0x1bd   :  { %v1969_v23 = vpop.eup %1968  ;;  %1859 = vmatmul.mubr.msk.f32.gmra.mxu0 %vm400_vm5, %v2003_v29 }
 0x1be   :  { %323 = vperm.xlu0 %1954, %v1969_v23   ;;  %1346 = vmatprep.mubr.f32.mxu0 %v2018_v18 }
 0x1bf   :  { %v1971_v9 = vpop.eup %1970 }
 0x1c0   :  { %v1420_v42 = vpop.permute.xlu1 %1419  ;;  %318 = vperm.xlu1 %1955, %v1971_v9  }
 0x1c1   :  { %v1396_v47 = vpop.permute.xlu0 %1395  ;;  %1860 = vmatmul.mubr.msk.f32.gmra.mxu0 %vm400_vm5, %v2004_v8 }
 0x1c2   :  { %v1455_v51 = vsel %vm644_vm6, %v1420_v42, %v1396_v47  ;;  %v1443_v15 = vsel %vm644_vm6, %v1396_v47, %v1420_v42  ;;  %1352 = vmatprep.mubr.f32.mxu0 %v2018_v18 }
 0x1c3   :  { %1497 = vmatprep.subr.mxu1 %v1443_v15 }
 0x1c4   :  { %v1619_v56 = vpop.permute.xlu1 %1618  ;;  %1498 = vmatpush1.msra.mxu1 %v1455_v51 }
 0x1c5   :  { %v1595_v32 = vpop.permute.xlu0 %1594  ;;  %1863 = vmatmul.mubr.msk.f32.vlgmr.msra.gmra.mxu1 %vm400_vm5, %v2767_v2  ;;  %1861 = vmatmul.mubr.msk.f32.gmra.mxu0 %vm400_vm5, %v2005_v0 }
 0x1c6   :  { %v1631_v33 = vsel %vm834_vm7, %v1595_v32, %v1619_v56  ;;  %v1643_v3 = vsel %vm834_vm7, %v1619_v56, %v1595_v32  ;;  %1537 = vmatprep.mubr.f32.mxu1 %v2018_v18  ;;  %1708 = vmatprep.mubr.f32.mxu0 %v2018_v18 }
 0x1c7   :  { %1652 = vmatprep.subr.mxu0 %v1643_v3  ;;  %1923 = vmatprep.subr.mxu1 %v1643_v3 }
 0x1c8   :  { %v1617_v31 = vpop.permute.xlu1 %1616  ;;  %1653 = vmatpush1.msra.mxu0 %v1631_v33  ;;  %1935 = vmatpush1.msra.mxu1 %v1631_v33 }
 0x1c9   :  { %v1593_v2 = vpop.permute.xlu0 %1592  ;;  %1864 = vmatmul.mubr.msk.f32.gmra.mxu1 %vm400_vm5, %v2784_v55 }
 0x1ca   :  { %v1630_v45 = vsel %vm834_vm7, %v1593_v2, %v1617_v31  ;;  %v1642_v6 = vsel %vm834_vm7, %v1617_v31, %v1593_v2  ;;  %1543 = vmatprep.mubr.f32.mxu1 %v2018_v18 }
 0x1cb   :  { %1654 = vmatprep.subr.mxu0 %v1642_v6  ;;  %1924 = vmatprep.subr.mxu1 %v1642_v6 }
 0x1cc   :  { %v1615_v46 = vpop.permute.xlu1 %1614  ;;  %1655 = vmatpush1.msra.mxu0 %v1630_v45  ;;  %1936 = vmatpush1.msra.mxu1 %v1630_v45 }
 0x1cd   :  { %v1591_v37 = vpop.permute.xlu0 %1590  ;;  %1865 = vmatmul.mubr.msk.f32.gmra.mxu1 %vm400_vm5, %v2804_v14 }
 0x1ce   :  { %v1629_v55 = vsel %vm834_vm7, %v1591_v37, %v1615_v46  ;;  %v1641_v38 = vsel %vm834_vm7, %v1615_v46, %v1591_v37  ;;  %1549 = vmatprep.mubr.f32.mxu1 %v2018_v18 }
 0x1cf   :  { %1656 = vmatprep.subr.mxu0 %v1641_v38  ;;  %1925 = vmatprep.subr.mxu1 %v1641_v38 }
 0x1d0   :  { %v1613_v49 = vpop.permute.xlu1 %1612  ;;  %1657 = vmatpush1.msra.mxu0 %v1629_v55  ;;  %1937 = vmatpush1.msra.mxu1 %v1629_v55 }
 0x1d1   :  { %v1589_v60 = vpop.permute.xlu0 %1588  ;;  %1866 = vmatmul.mubr.msk.f32.gmra.mxu1 %vm400_vm5, %v2824_v36 }
 0x1d2   :  { %v1628_v14 = vsel %vm834_vm7, %v1589_v60, %v1613_v49  ;;  %v1640_v63 = vsel %vm834_vm7, %v1613_v49, %v1589_v60  ;;  %1714 = vmatprep.mubr.f32.mxu1 %v2018_v18 }
 0x1d3   :  { %1658 = vmatprep.subr.mxu0 %v1640_v63  ;;  %1926 = vmatprep.subr.mxu1 %v1640_v63 }
 0x1d4   :  { %v1611_v5 = vpop.permute.xlu1 %1610  ;;  %1659 = vmatpush1.msra.mxu0 %v1628_v14  ;;  %1938 = vmatpush1.msra.mxu1 %v1628_v14 }
 0x1d5   :  { %v1587_v4 = vpop.permute.xlu0 %1586  ;;  %v1919_v23 = vpop.f32.mrf.mxu1 }
 0x1d6   :  { %v1627_v29 = vsel %vm834_vm7, %v1587_v4, %v1611_v5  ;;  %v1639_v36 = vsel %vm834_vm7, %v1611_v5, %v1587_v4  ;;  %v1105_v9 = vadd.f32 %v1919_v23, %v3041_v50 }
 0x1d7   :  { %1660 = vmatprep.subr.mxu0 %v1639_v36  ;;  %1927 = vmatprep.subr.mxu1 %v1639_v36  ;;  %v1099_v42 = vpop.f32.mrf.mxu1 }
 0x1d8   :  { %v1609_v47 = vpop.permute.xlu1 %1608  ;;  %1661 = vmatpush1.msra.mxu0 %v1627_v29  ;;  %1939 = vmatpush1.msra.mxu1 %v1627_v29  ;;  %v1841_v8 = vmul.f32 -1.442695, %v1105_v9  ;;  %v1100_v51 = vadd.f32 %v1099_v42, %v3076_v58 }
 0x1d9   :  { %v1585_v15 = vpop.permute.xlu0 %1584  ;;  %v1922_v56 = vpop.f32.mrf.mxu1 }
 0x1da   :  { %v1626_v32 = vsel %vm834_vm7, %v1585_v15, %v1609_v47  ;;  %v1638_v0 = vsel %vm834_vm7, %v1609_v47, %v1585_v15  ;;  %1972 = vpow2.f32 %v1841_v8  ;;  %v1840_v33 = vmul.f32 -1.442695, %v1100_v51 }
 0x1db   :  { %1662 = vmatprep.subr.mxu0 %v1638_v0  ;;  %1928 = vmatprep.subr.mxu1 %v1638_v0  ;;  %v1115_v50 = vadd.f32 %v1922_v56, %v3089_v13  ;;  %v1109_v3 = vpop.f32.mrf.mxu1 }
 0x1dc   :  { %v1607_v31 = vpop.permute.xlu1 %1606  ;;  %1663 = vmatpush1.msra.mxu0 %v1626_v32  ;;  %1940 = vmatpush1.msra.mxu1 %v1626_v32  ;;  %1974 = vpow2.f32 %v1840_v33  ;;  %v1110_v58 = vadd.f32 %v1109_v3, %v3105_v28 }
 0x1dd   :  { %v1583_v2 = vpop.permute.xlu0 %1582  ;;  %v1843_v45 = vmul.f32 -1.442695, %v1115_v50 }
 0x1de   :  { %v1625_v6 = vsel %vm834_vm7, %v1583_v2, %v1607_v31  ;;  %v1637_v46 = vsel %vm834_vm7, %v1607_v31, %v1583_v2  ;;  %v1842_v37 = vmul.f32 -1.442695, %v1110_v58 }
 0x1df   :  { %1664 = vmatprep.subr.mxu0 %v1637_v46  ;;  %1929 = vmatprep.subr.mxu1 %v1637_v46  ;;  %1976 = vpow2.f32 %v1843_v45 }
 0x1e0   :  { %v1605_v13 = vpop.permute.xlu1 %1604  ;;  %1665 = vmatpush1.msra.mxu0 %v1625_v6  ;;  %1941 = vmatpush1.msra.mxu1 %v1625_v6  ;;  %1978 = vpow2.f32 %v1842_v37 }
 0x1e1   :  { %v1581_v55 = vpop.permute.xlu0 %1580 }
 0x1e2   :  { %v1624_v28 = vsel %vm834_vm7, %v1581_v55, %v1605_v13  ;;  %v1636_v38 = vsel %vm834_vm7, %v1605_v13, %v1581_v55 }
 0x1e3   :  { %1666 = vmatprep.subr.mxu0 %v1636_v38  ;;  %1930 = vmatprep.subr.mxu1 %v1636_v38 }
 0x1e4   :  { %v1603_v49 = vpop.permute.xlu1 %1602  ;;  %1667 = vmatpush1.msra.mxu0 %v1624_v28  ;;  %1942 = vmatpush1.msra.mxu1 %v1624_v28 }
 0x1e5   :  { %v1579_v60 = vpop.permute.xlu0 %1578 }
 0x1e6   :  { %v1623_v14 = vsel %vm834_vm7, %v1579_v60, %v1603_v49  ;;  %v1635_v63 = vsel %vm834_vm7, %v1603_v49, %v1579_v60 }
 0x1e7   :  { %v1973_v5 = vpop.eup %1972  ;;  %1668 = vmatprep.subr.mxu0 %v1635_v63  ;;  %1931 = vmatprep.subr.mxu1 %v1635_v63 }
 0x1e8   :  { %v1601_v4 = vpop.permute.xlu1 %1600  ;;  %1669 = vmatpush1.msra.mxu0 %v1623_v14  ;;  %1943 = vmatpush1.msra.mxu1 %v1623_v14  ;;  %v1131_v23 = vadd.f32 1.0, %v1973_v5  ;;  %v39_v14 = vand.u32 15, %v2194_v21  ;;  %v46_v5 = vand.u32 15, %v2197_v22 }
 0x1e9   :  { %v1975_v29 = vpop.eup %1974  ;;  %v1577_v36 = vpop.permute.xlu0 %1576 }
 0x1ea   :  { %v1622_v9 = vsel %vm834_vm7, %v1577_v36, %v1601_v4  ;;  %v1634_v42 = vsel %vm834_vm7, %v1601_v4, %v1577_v36  ;;  %1980 = vrcp.f32 %v1131_v23  ;;  %v1130_v47 = vadd.f32 1.0, %v1975_v29 }
 0x1eb   :  { %1670 = vmatprep.subr.mxu0 %v1634_v42  ;;  %1932 = vmatprep.subr.mxu1 %v1634_v42  ;;  %vm3287_vm9 = vcmp.ne.s32.totalorder %v39_v14, 0  ;;  %vm3293_vm10 = vcmp.ne.s32.totalorder %v46_v5, 0  ;;  %vm3313_vm11 = vcmp.ne.s32.totalorder %v39_v14, 15  ;;  %vm3324_vm12 = vcmp.ne.s32.totalorder %v46_v5, 15  ;;  %v2007_v5 = vld [vmem:[%s3561_s0 + $0x8] sm:$0xff] }
 0x1ec   :  { %v1977_v8 = vpop.eup %1976  ;;  %v1599_v51 = vpop.permute.xlu1 %1598  ;;  %1671 = vmatpush1.msra.mxu0 %v1622_v9  ;;  %1944 = vmatpush1.msra.mxu1 %v1622_v9  ;;  %1982 = vrcp.f32 %v1130_v47 }
 0x1ed   :  { %v1979_v15 = vpop.eup %1978  ;;  %v1575_v56 = vpop.permute.xlu0 %1574  ;;  %v1133_v32 = vadd.f32 1.0, %v1977_v8 }
 0x1ee   :  { %v1621_v0 = vsel %vm834_vm7, %v1575_v56, %v1599_v51  ;;  %v1633_v33 = vsel %vm834_vm7, %v1599_v51, %v1575_v56  ;;  %v1132_v50 = vadd.f32 1.0, %v1979_v15 }
 0x1ef   :  { %1672 = vmatprep.subr.mxu0 %v1633_v33  ;;  %1933 = vmatprep.subr.mxu1 %v1633_v33  ;;  %1984 = vrcp.f32 %v1133_v32 }
 0x1f0   :  { %v1597_v3 = vpop.permute.xlu1 %1596  ;;  %1673 = vmatpush1.msra.mxu0 %v1621_v0  ;;  %1945 = vmatpush1.msra.mxu1 %v1621_v0  ;;  %1986 = vrcp.f32 %v1132_v50 }
 0x1f1   :  { %v1573_v31 = vpop.permute.xlu0 %1572 }
 0x1f2   :  { %v1620_v58 = vsel %vm834_vm7, %v1573_v31, %v1597_v3  ;;  %v1632_v2 = vsel %vm834_vm7, %v1597_v3, %v1573_v31 }
 0x1f3   :  { %1674 = vmatprep.subr.mxu0 %v1632_v2  ;;  %1934 = vmatprep.subr.mxu1 %v1632_v2 }
 0x1f4   :  { %1675 = vmatpush1.msra.mxu0 %v1620_v58  ;;  %1946 = vmatpush1.msra.mxu1 %v1620_v58 }
 0x1f5   :  { %1867 = vmatmul.mubr.msk.f32.vlgmr.msra.gmra.mxu0 %vm400_vm5, %v2953_v35  ;;  %1868 = vmatmul.mubr.msk.f32.vlgmr.msra.gmra.mxu1 %vm400_vm5, %v2974_v59 }
 0x1f6   :  { %1720 = vmatprep.mubr.f32.mxu1 %v2018_v18 }
 0x1f7   :  { %v1981_v45 = vpop.eup %1980 }
 0x1f8   :  { %1149 = vperm.xlu0 %1954, %v1981_v45   ;;  %v2006_v45 = vld [vmem:[%s3561_s0] sm:$0xff] }
 0x1f9   :  { %v1983_v6 = vpop.eup %1982  ;;  %1869 = vmatmul.mubr.msk.f32.gmra.mxu1 %vm400_vm5, %v2994_v57 }
 0x1fa   :  { %1726 = vmatprep.mubr.f32.mxu1 %v2018_v18  ;;  %1144 = vperm.xlu1 %1955, %v1983_v6  }
 0x1fc   :  { %v1985_v46 = vpop.eup %1984 }
 0x1fd   :  { %v1987_v37 = vpop.eup %1986  ;;  %1870 = vmatmul.mubr.msk.f32.gmra.mxu1 %vm400_vm5, %v3016_v24  ;;  %1159 = vperm.xlu0 %1954, %v1985_v46   ;;  %v3269_v13 = vpop.permute.xlu1 %114 }
 0x1fe   :  { %1154 = vperm.xlu1 %1955, %v1987_v37   ;;  %v3271_v38 = vpop.permute.xlu0 %109  ;;  %v3301_v9 = vadd.f32 %v2867_v26, %v3269_v13  ;;  %v3305_v22 = vadd.f32 %v2871_v43, %v3269_v13 }
 0x1ff   :  { %v554_v21 = vadd.f32 %v2855_v16, %v3271_v38  ;;  %v555_v16 = vadd.f32 %v2859_v1, %v3271_v38 }
 0x200   :  { %v564_v50 = vmax.f32 %v3301_v9, 0.0  ;;  %v565_v3 = vmax.f32 %v3305_v22, 0.0  ;;  %v2013_v22 = vld [vmem:[%s3561_s0 + $0x38] sm:$0xff] }
 0x201   :  { %v3273_v49 = vpop.permute.xlu1 %119  ;;  %v562_v33 = vmax.f32 %v554_v21, 0.0  ;;  %v563_v46 = vmax.f32 %v555_v16, 0.0 }
 0x202   :  { %v3275_v18 = vpop.permute.xlu0 %124  ;;  %v3340_v37 = vadd.f32 %v2879_v39, %v3273_v49  ;;  %v3353_v39 = vadd.f32 %v2883_v61, %v3273_v49 }
 0x213   :  { %v3277_v60 = vpop.permute.xlu1 %133 }
 0x214   :  { %v3282_v63 = vpop.permute.xlu0 %138 }
 0x217   :  { %v3285_v4 = vpop.permute.xlu1 %143 }
 0x218   :  { %v747_v35 = vpop.f32.mrf.mxu0  ;;  %v3309_v47 = vpop.permute.xlu0 %148 }
 0x219   :  { %v770_v42 = vsel %vm3287_vm9, %v747_v35, 0.0 }
 0x21a   :  { %v749_v59 = vpop.f32.mrf.mxu0  ;;  %v778_v43 = vadd.f32 %v770_v42, %v2788_v53 }
 0x21b   :  { %v771_v26 = vsel %vm3293_vm10, %v749_v59, 0.0 }
 0x21c   :  { %v753_v55 = vpop.f32.mrf.mxu0  ;;  %v779_v31 = vadd.f32 %v771_v26, %v2794_v62 }
 0x21d   :  { %v772_v56 = vsel %vm3287_vm9, %v753_v55, 0.0 }
 0x21e   :  { %v755_v28 = vpop.f32.mrf.mxu0  ;;  %v780_v35 = vadd.f32 %v772_v56, %v2808_v17 }
 0x21f   :  { %v773_v53 = vsel %vm3293_vm10, %v755_v28, 0.0 }
 0x220   :  { %v759_v57 = vpop.f32.mrf.mxu0  ;;  %v781_v17 = vadd.f32 %v773_v53, %v2814_v27 }
 0x221   :  { %v774_v55 = vsel %vm3287_vm9, %v759_v57, 0.0 }
 0x222   :  { %v3280_v24 = vpop.f32.mrf.mxu0  ;;  %v782_v27 = vadd.f32 %v774_v55, %v2828_v40  ;;  %v2010_v55 = vld [vmem:[%s3561_s0 + $0x20] sm:$0xff] }
 0x223   :  { %v775_v42 = vsel %vm3293_vm10, %v3280_v24, 0.0 }
 0x224   :  { %v3291_v29 = vpop.f32.mrf.mxu0  ;;  %v783_v40 = vadd.f32 %v775_v42, %v2834_v44 }
 0x225   :  { %v776_v24 = vsel %vm3287_vm9, %v3291_v29, 0.0 }
 0x226   :  { %v3311_v8 = vpop.f32.mrf.mxu0 }
 0x227   :  { %v777_v29 = vsel %vm3293_vm10, %v3311_v8, 0.0  ;;  %v560_v8 = vadd.f32 %v2891_v34, %v3275_v18 }
 0x234   :  { %v314_v59 = vpop.permute.xlu0 %313 }
 0x237   :  { %v309_v15 = vpop.permute.xlu1 %308 }
 0x238   :  { %v326_v6 = vmul.f32 %v2006_v45, %v309_v15  ;;  %v327_v21 = vmul.f32 %v2007_v5, %v309_v15  ;;  %v2008_v15 = vld [vmem:[%s3561_s0 + $0x10] sm:$0xff] }
 0x239   :  { %v328_v61 = vmul.f32 %v2008_v15, %v314_v59 }
 0x248   :  { %v937_v32 = vpop.f32.mrf.mxu0 }
 0x249   :  { %v960_v1 = vsel %vm3313_vm11, %v937_v32, 0.0  ;;  %v319_v32 = vpop.permute.xlu1 %318 }
 0x24a   :  { %v968_v58 = vadd.f32 %v960_v1, %v778_v43  ;;  %v939_v2 = vpop.f32.mrf.mxu0 }
 0x24b   :  { %v961_v62 = vsel %vm3324_vm12, %v939_v2, 0.0 }
 0x24c   :  { %v976_v28 = vadd.f32 %v968_v58, %v3277_v60  ;;  %v969_v14 = vadd.f32 %v961_v62, %v779_v31  ;;  %v943_v9 = vpop.f32.mrf.mxu0  ;;  %v2009_v31 = vld [vmem:[%s3561_s0 + $0x18] sm:$0xff] }
 0x24d   :  { %v962_v57 = vsel %vm3313_vm11, %v943_v9, 0.0  ;;  %v329_v53 = vmul.f32 %v2009_v31, %v314_v59  ;;  %v330_v59 = vmul.f32 %v2010_v55, %v319_v32  ;;  %v784_v9 = vadd.f32 %v776_v24, %v2843_v11 }
 0x24e   :  { %v977_v16 = vadd.f32 %v969_v14, %v3277_v60  ;;  %v984_v26 = vadd.f32 %v976_v28, %v326_v6  ;;  %v970_v43 = vadd.f32 %v962_v57, %v780_v35  ;;  %v945_v56 = vpop.f32.mrf.mxu0  ;;  %v566_v11 = vmax.f32 %v3340_v37, 0.0 }
 0x24f   :  { %v963_v1 = vsel %vm3324_vm12, %v945_v56, 0.0  ;;  %v785_v56 = vadd.f32 %v777_v29, %v2847_v52  ;;  %v561_v31 = vadd.f32 %v2895_v41, %v3275_v18 }
 0x250   :  { %v985_v58 = vadd.f32 %v977_v16, %v327_v21  ;;  %v992_v2 = vadd.f32 %v984_v26, %v562_v33  ;;  %v978_v45 = vadd.f32 %v970_v43, %v3282_v63  ;;  %v971_v6 = vadd.f32 %v963_v1, %v781_v17  ;;  %v949_v35 = vpop.f32.mrf.mxu0  ;;  %v324_v21 = vpop.permute.xlu0 %323 }
 0x251   :  { %v964_v62 = vsel %vm3313_vm11, %v949_v35, 0.0  ;;  %v567_v1 = vmax.f32 %v3353_v39, 0.0  ;;  %v569_v29 = vmax.f32 %v561_v31, 0.0 }
 0x252   :  { %v993_v28 = vadd.f32 %v985_v58, %v563_v46  ;;  %1000 = vst [vmem:[%s3570_s8] sm:$0xff] %v992_v2  ;;  %v979_v33 = vadd.f32 %v971_v6, %v3282_v63  ;;  %v986_v44 = vadd.f32 %v978_v45, %v328_v61  ;;  %v972_v14 = vadd.f32 %v964_v62, %v782_v27  ;;  %v951_v5 = vpop.f32.mrf.mxu0  ;;  %v2011_v46 = vld [vmem:[%s3561_s0 + $0x28] sm:$0xff]  ;;  %v2012_v61 = vld [vmem:[%s3561_s0 + $0x30] sm:$0xff] }
 0x253   :  { %v965_v17 = vsel %vm3324_vm12, %v951_v5, 0.0  ;;  %v331_v42 = vmul.f32 %v2011_v46, %v319_v32  ;;  %v332_v32 = vmul.f32 %v2012_v61, %v324_v21  ;;  %v568_v6 = vmax.f32 %v560_v8, 0.0 }
 0x254   :  { %1001 = vst [vmem:[%s3570_s8 + $0x8] sm:$0xff] %v993_v28  ;;  %v987_v57 = vadd.f32 %v979_v33, %v329_v53  ;;  %v994_v16 = vadd.f32 %v986_v44, %v564_v50  ;;  %v980_v26 = vadd.f32 %v972_v14, %v3285_v4  ;;  %v973_v43 = vadd.f32 %v965_v17, %v783_v40  ;;  %v955_v34 = vpop.f32.mrf.mxu0 }
 0x255   :  { %v966_v15 = vsel %vm3313_vm11, %v955_v34, 0.0 }
 0x256   :  { %v995_v27 = vadd.f32 %v987_v57, %v565_v3  ;;  %1002 = vst [vmem:[%s3570_s8 + $0x10] sm:$0xff] %v994_v16  ;;  %v981_v50 = vadd.f32 %v973_v43, %v3285_v4  ;;  %v988_v37 = vadd.f32 %v980_v26, %v330_v59  ;;  %v974_v24 = vadd.f32 %v966_v15, %v784_v9  ;;  %v957_v52 = vpop.f32.mrf.mxu0 }
 0x257   :  { %v967_v53 = vsel %vm3324_vm12, %v957_v52, 0.0  ;;  %v333_v3 = vmul.f32 %v2013_v22, %v324_v21 }
 0x258   :  { %1003 = vst [vmem:[%s3570_s8 + $0x18] sm:$0xff] %v995_v27  ;;  %v989_v58 = vadd.f32 %v981_v50, %v331_v42  ;;  %v996_v2 = vadd.f32 %v988_v37, %v566_v11  ;;  %v982_v45 = vadd.f32 %v974_v24, %v3309_v47  ;;  %v975_v39 = vadd.f32 %v967_v53, %v785_v56 }
 0x25a   :  { %v997_v35 = vadd.f32 %v989_v58, %v567_v1  ;;  %1004 = vst [vmem:[%s3570_s8 + $0x20] sm:$0xff] %v996_v2  ;;  %v983_v41 = vadd.f32 %v975_v39, %v3309_v47  ;;  %v990_v40 = vadd.f32 %v982_v45, %v332_v32 }
 0x25c   :  { %1005 = vst [vmem:[%s3570_s8 + $0x28] sm:$0xff] %v997_v35  ;;  %v991_v62 = vadd.f32 %v983_v41, %v333_v3  ;;  %v998_v55 = vadd.f32 %v990_v40, %v568_v6 }
 0x25e   :  { %v999_v59 = vadd.f32 %v991_v62, %v569_v29  ;;  %1006 = vst [vmem:[%s3570_s8 + $0x30] sm:$0xff] %v998_v55 }
 0x260   :  { %1007 = vst [vmem:[%s3570_s8 + $0x38] sm:$0xff] %v999_v59  ;;  %v1300_v28 = vpop.f32.mrf.mxu0 }
 0x262   :  { %v1302_v33 = vpop.f32.mrf.mxu0 }
 0x264   :  { %v1306_v44 = vpop.f32.mrf.mxu0 }
 0x266   :  { %v1308_v14 = vpop.f32.mrf.mxu0 }
 0x268   :  { %v3438_v5 = vpop.f32.mrf.mxu0 }
 0x26a   :  { %v3440_v21 = vpop.f32.mrf.mxu0 }
 0x26c   :  { %v3442_v8 = vpop.f32.mrf.mxu0 }
 0x26e   :  { %v3444_v9 = vpop.f32.mrf.mxu0 }
 0x270   :  { %v1324_v17 = vpop.f32.mrf.mxu0 }
 0x271   :  { %v1357_v58 = vadd.f32 %v1324_v17, %v3271_v38 }
 0x272   :  { %v1326_v46 = vpop.f32.mrf.mxu0 }
 0x273   :  { %v3463_v2 = vadd.f32 %v1326_v46, %v3271_v38  ;;  %v1150_v39 = vpop.permute.xlu0 %1149  ;;  %v1365_v41 = vmax.f32 %v1357_v58, 0.0 }
 0x274   :  { %v1330_v42 = vpop.f32.mrf.mxu0  ;;  %v1164_v40 = vmul.f32 %v3048_v54, %v1150_v39  ;;  %v1165_v59 = vmul.f32 %v3035_v48, %v1150_v39 }
 0x276   :  { %v1332_v57 = vpop.f32.mrf.mxu0 }
 0x277   :  { %v3467_v12 = vadd.f32 %v1332_v57, %v3269_v13 }
 0x278   :  { %v1336_v16 = vpop.f32.mrf.mxu0 }
 0x279   :  { %v1368_v46 = vmax.f32 %v3467_v12, 0.0 }
 0x27a   :  { %v3446_v26 = vpop.f32.mrf.mxu0 }
 0x27d   :  { %v3448_v43 = vpop.f32.mrf.mxu0 }
 0x27f   :  { %v3450_v34 = vpop.f32.mrf.mxu0 }
 0x281   :  { %v1348_v11 = vpop.f32.mrf.mxu0 }
 0x282   :  { %v1373_v56 = vadd.f32 %v1348_v11, %v2906_v10 }
 0x283   :  { %v1350_v15 = vpop.f32.mrf.mxu0 }
 0x284   :  { %v1374_v61 = vadd.f32 %v1350_v15, %v2906_v10  ;;  %v1145_v10 = vpop.permute.xlu1 %1144 }
 0x285   :  { %v1354_v32 = vpop.f32.mrf.mxu0  ;;  %v1533_v52 = vpop.f32.mrf.mxu1  ;;  %v1163_v57 = vmul.f32 %v3060_v20, %v1145_v10 }
 0x286   :  { %v1377_v27 = vcombine.low %v1373_v56, %v1374_v61  ;;  %v1556_v6 = vsel %vm3287_vm9, %v1533_v52, 0.0  ;;  %v3484_v56 = vadd.f32 %v1336_v16, %v3273_v49 }
 0x287   :  { %v1355_v50 = vpop.f32.mrf.mxu0  ;;  %v1535_v1 = vpop.f32.mrf.mxu1  ;;  %v1564_v54 = vadd.f32 %v1556_v6, %v1300_v28 }
 0x288   :  { %v1384_v37 = vrot.slane %v1377_v27, %v2919_v19  ;;  %v1155_v29 = vpop.permute.xlu1 %1154  ;;  %v1557_v38 = vsel %vm3293_vm10, %v1535_v1, 0.0 }
 0x289   :  { %v1539_v31 = vpop.f32.mrf.mxu1  ;;  %v1166_v15 = vmul.f32 %v3027_v30, %v1155_v29  ;;  %v1565_v27 = vadd.f32 %v1557_v38, %v1302_v33 }
 0x28a   :  { %v1391_v24 = vrot.slane %v1384_v37, %v2919_v19  ;;  %v1359_v19 = vadd.f32 %v1330_v42, %v3269_v13  ;;  %v1558_v35 = vsel %vm3287_vm9, %v1539_v31, 0.0  ;;  %v1366_v13 = vmax.f32 %v3463_v2, 0.0 }
 0x28b   :  { %v1541_v53 = vpop.f32.mrf.mxu1  ;;  %v1162_v42 = vmul.f32 %v3069_v25, %v1145_v10  ;;  %v1566_v11 = vadd.f32 %v1558_v35, %v1306_v44 }
 0x28c   :  { %1862 = vst.msk [vmem:[%s3567_s9 + $0x2] sm:$0x3] %vm2935_vm8, %v1391_v24  ;;  %v1559_v62 = vsel %vm3293_vm10, %v1541_v53, 0.0  ;;  %v1367_v17 = vmax.f32 %v1359_v19, 0.0 }
 0x28d   :  { %v1545_v22 = vpop.f32.mrf.mxu1  ;;  %v1567_v50 = vadd.f32 %v1559_v62, %v1308_v14  ;;  %v1167_v14 = vmul.f32 %v3021_v7, %v1155_v29  ;;  %v1362_v7 = vadd.f32 %v3446_v26, %v3273_v49 }
 0x28e   :  { %v1560_v20 = vsel %vm3287_vm9, %v1545_v22, 0.0 }
 0x28f   :  { %v1547_v3 = vpop.f32.mrf.mxu1  ;;  %v1568_v10 = vadd.f32 %v1560_v20, %v3438_v5 }
 0x290   :  { %v1561_v25 = vsel %vm3293_vm10, %v1547_v3, 0.0 }
 0x291   :  { %v1551_v45 = vpop.f32.mrf.mxu1  ;;  %v1569_v23 = vadd.f32 %v1561_v25, %v3440_v21 }
 0x292   :  { %v1562_v33 = vsel %vm3287_vm9, %v1551_v45, 0.0 }
 0x293   :  { %v1553_v55 = vpop.f32.mrf.mxu1  ;;  %v1570_v6 = vadd.f32 %v1562_v33, %v3442_v8 }
 0x294   :  { %v1563_v5 = vsel %vm3293_vm10, %v1553_v55, 0.0 }
 0x295   :  { %v1571_v8 = vadd.f32 %v1563_v5, %v3444_v9 }
 0x2b5   :  { %v1710_v61 = vpop.f32.mrf.mxu0  ;;  %v1716_v32 = vpop.f32.mrf.mxu1 }
 0x2b6   :  { %v1733_v48 = vsel %vm3313_vm11, %v1710_v61, 0.0  ;;  %v1735_v37 = vsel %vm3313_vm11, %v1716_v32, 0.0 }
 0x2b7   :  { %v1741_v28 = vadd.f32 %v1733_v48, %v1564_v54  ;;  %v1743_v44 = vadd.f32 %v1735_v37, %v1566_v11  ;;  %v1712_v16 = vpop.f32.mrf.mxu0  ;;  %v1718_v30 = vpop.f32.mrf.mxu1  ;;  %v1364_v54 = vadd.f32 %v3450_v34, %v3275_v18  ;;  %v2014_v11 = vld [vmem:[%s3561_s0 + $0x70] sm:$0xff]  ;;  %v2015_v34 = vld [vmem:[%s3561_s0 + $0x78] sm:$0xff] }
 0x2b8   :  { %v1734_v24 = vsel %vm3324_vm12, %v1712_v16, 0.0  ;;  %v1736_v52 = vsel %vm3324_vm12, %v1718_v30, 0.0 }
 0x2b9   :  { %v1749_v1 = vadd.f32 %v1741_v28, %v3277_v60  ;;  %v1751_v31 = vadd.f32 %v1743_v44, %v3282_v63  ;;  %v1742_v53 = vadd.f32 %v1734_v24, %v1565_v27  ;;  %v1744_v22 = vadd.f32 %v1736_v52, %v1567_v50  ;;  %v1722_v3 = vpop.f32.mrf.mxu1 }
 0x2ba   :  { %v1737_v58 = vsel %vm3313_vm11, %v1722_v3, 0.0  ;;  %v1372_v48 = vmax.f32 %v1364_v54, 0.0 }
 0x2bb   :  { %v1757_v2 = vadd.f32 %v1749_v1, %v1162_v42  ;;  %v1759_v45 = vadd.f32 %v1751_v31, %v1164_v40  ;;  %v1750_v19 = vadd.f32 %v1742_v53, %v3277_v60  ;;  %v1752_v12 = vadd.f32 %v1744_v22, %v3282_v63  ;;  %v1724_v39 = vpop.f32.mrf.mxu1  ;;  %v1160_v40 = vpop.permute.xlu0 %1159 }
 0x2bc   :  { %v1745_v35 = vadd.f32 %v1737_v58, %v1568_v10  ;;  %v1738_v21 = vsel %vm3324_vm12, %v1724_v39, 0.0  ;;  %v1363_v60 = vadd.f32 %v3448_v43, %v3275_v18  ;;  %v1168_v61 = vmul.f32 %v2014_v11, %v1160_v40 }
 0x2bd   :  { %v1765_v49 = vadd.f32 %v1757_v2, %v1365_v41  ;;  %v1767_v26 = vadd.f32 %v1759_v45, %v1367_v17  ;;  %v1758_v29 = vadd.f32 %v1750_v19, %v1163_v57  ;;  %v1760_v38 = vadd.f32 %v1752_v12, %v1165_v59  ;;  %v1728_v62 = vpop.f32.mrf.mxu1 }
 0x2be   :  { %v1753_v63 = vadd.f32 %v1745_v35, %v3285_v4  ;;  %v1746_v42 = vadd.f32 %v1738_v21, %v1569_v23  ;;  %v1739_v36 = vsel %vm3313_vm11, %v1728_v62, 0.0  ;;  %v1369_v17 = vmax.f32 %v3484_v56, 0.0 }
 0x2bf   :  { %1871 = vst [vmem:[%s3570_s8 + $0x40] sm:$0xff] %v1765_v49  ;;  %1873 = vst [vmem:[%s3570_s8 + $0x50] sm:$0xff] %v1767_v26  ;;  %v1766_v41 = vadd.f32 %v1758_v29, %v1366_v13  ;;  %v1768_v55 = vadd.f32 %v1760_v38, %v1368_v46  ;;  %v1747_v43 = vadd.f32 %v1739_v36, %v1570_v6  ;;  %v1730_v59 = vpop.f32.mrf.mxu1  ;;  %v1370_v13 = vmax.f32 %v1362_v7, 0.0 }
 0x2c0   :  { %v1761_v57 = vadd.f32 %v1753_v63, %v1166_v15  ;;  %v1754_v51 = vadd.f32 %v1746_v42, %v3285_v4  ;;  %v1740_v9 = vsel %vm3324_vm12, %v1730_v59, 0.0  ;;  %v1371_v18 = vmax.f32 %v1363_v60, 0.0 }
 0x2c1   :  { %1872 = vst [vmem:[%s3570_s8 + $0x48] sm:$0xff] %v1766_v41  ;;  %1874 = vst [vmem:[%s3570_s8 + $0x58] sm:$0xff] %v1768_v55  ;;  %v1755_v4 = vadd.f32 %v1747_v43, %v3309_v47  ;;  %v1748_v0 = vadd.f32 %v1740_v9, %v1571_v8  ;;  %v1169_v15 = vmul.f32 %v2015_v34, %v1160_v40 }
 0x2c2   :  { %v1769_v46 = vadd.f32 %v1761_v57, %v1369_v17  ;;  %v1762_v56 = vadd.f32 %v1754_v51, %v1167_v14 }
 0x2c3   :  { %v1763_v32 = vadd.f32 %v1755_v4, %v1168_v61  ;;  %v1756_v27 = vadd.f32 %v1748_v0, %v3309_v47 }
 0x2c4   :  { %1875 = vst [vmem:[%s3570_s8 + $0x60] sm:$0xff] %v1769_v46  ;;  %v1770_v50 = vadd.f32 %v1762_v56, %v1370_v13 }
 0x2c5   :  { %v1771_v37 = vadd.f32 %v1763_v32, %v1371_v18  ;;  %v1764_v20 = vadd.f32 %v1756_v27, %v1169_v15 }
 0x2c6   :  { %1876 = vst [vmem:[%s3570_s8 + $0x68] sm:$0xff] %v1770_v50 }
 0x2c7   :  { %1877 = vst [vmem:[%s3570_s8 + $0x70] sm:$0xff] %v1771_v37  ;;  %v1772_v25 = vadd.f32 %v1764_v20, %v1372_v48 }
 0x2c9   :  { %1878 = vst [vmem:[%s3570_s8 + $0x78] sm:$0xff] %v1772_v25 }

</bundles_post_ra>
